<compile_context>
chip_gen: v5e
topology: v5e:2x2
jax: 0.10.0
libtpu: 0.0.40
codegen_flags: <defaults>
</compile_context>

<pallas_src>
import functools

import numpy as np
import jax
import jax.numpy as jnp
from jax.experimental import pallas as pl
from jax.experimental.pallas import tpu as pltpu

HIDDEN = 32       # hidden_size
OUTPUT = 64       # output_size (vocab)
N_LAYERS = 1      # n_layers
LANE = 128        # TPU lane width: all vectors padded to 128 lanes
SEQ_LEN = 8       # decode steps per kernel launch (demo)
BIG_NEG = -1e30   # mask value for padded vocab lanes (folded into b_out)


# -----------------------------------------------------------------------------
# Kernel: one program runs all T decode steps; projection/softmax deferred.
# -----------------------------------------------------------------------------
def decoder_kernel(n_layers, seq_len,
                   x_ref, w_comb_ref, w_out_ref, b_ref, h0_ref,
                   logp_ref, hhist_ref):
    # ---- hoisted once: fused weight + bias rows (no per-step slices) --------
    w_comb = w_comb_ref[...]                       # (LANE, 4*LANE)
    b_r = b_ref[0:1, :]
    b_z = b_ref[1:2, :]
    b_in = b_ref[2:3, :]
    b_hn = b_ref[3:4, :]
    b_o = b_ref[4:5, :]

    # Clean pad rows so the batched projection below sees zeros there.
    hhist_ref[...] = jnp.zeros_like(hhist_ref)

    def step(t, h):
        x = x_ref[pl.ds(t, 1), :]                  # (1, LANE) pre-gathered emb
        for _ in range(n_layers):                  # static; mirrors module quirk
            # Pack relu(x) (lanes 0:H) with h rolled by H lanes.  w_comb has the
            # hidden rows duplicated at H:2H and LANE-H:LANE, so either roll
            # direction convention produces the same matmul result.
            xh = jnp.maximum(x, 0.0) + pltpu.roll(h, shift=HIDDEN, axis=1)
            g = jnp.dot(xh, w_comb,
                        preferred_element_type=jnp.float32)      # (1, 4*LANE)
            r = jax.nn.sigmoid(g[:, 0:LANE] + b_r)
            z = jax.nn.sigmoid(g[:, LANE:2 * LANE] + b_z)
            n = jnp.tanh(g[:, 2 * LANE:3 * LANE] + b_in
                         + r * (g[:, 3 * LANE:4 * LANE] + b_hn))
            h = (1.0 - z) * n + z * h              # padded lanes stay exactly 0
            x = h
        hhist_ref[pl.ds(t, 1), :] = h              # resident hidden history
        return h

    jax.lax.fori_loop(0, seq_len, step, h0_ref[...],
                      unroll=True if seq_len <= 64 else 8)

    # ---- deferred projection + log_softmax, batched over all timesteps -----
    logits = jnp.dot(hhist_ref[...], w_out_ref[...],
                     preferred_element_type=jnp.float32) + b_o   # (T_pad, LANE)
    m = jnp.max(logits, axis=-1, keepdims=True)
    lse = jnp.log(jnp.sum(jnp.exp(logits - m), axis=-1, keepdims=True)) + m
    logp_ref[...] = logits - lse                   # lane-dense (T_pad, LANE)


# -----------------------------------------------------------------------------
# Parameters (raw PyTorch layout) and one-time packing for the kernel
# -----------------------------------------------------------------------------
def init_params(key, hidden=HIDDEN, output=OUTPUT):
    ks = jax.random.split(key, 7)
    s = 1.0 / np.sqrt(hidden)
    u = lambda k, shape: jax.random.uniform(k, shape, jnp.float32, -s, s)
    return dict(
        embedding=jax.random.normal(ks[0], (output, hidden), jnp.float32),
        w_ih=u(ks[1], (3 * hidden, hidden)),   # gru.weight_ih_l0 (r|z|n rows)
        w_hh=u(ks[2], (3 * hidden, hidden)),   # gru.weight_hh_l0
        b_ih=u(ks[3], (3 * hidden,)),
        b_hh=u(ks[4], (3 * hidden,)),
        w_out=u(ks[5], (output, hidden)),      # out.weight
        b_out=u(ks[6], (output,)),
    )


def prepare_params(params, hidden=HIDDEN, output=OUTPUT, lane=LANE):
    """One-time repacking: fuse/transpose gate weights, fold biases, pad to 128 lanes."""
    H, V = hidden, output
    f32 = jnp.float32

    emb = jnp.zeros((V, lane), f32).at[:, :H].set(params["embedding"].astype(f32))

    w_ih, w_hh = params["w_ih"], params["w_hh"]          # (3H, H), rows r|z|n
    # Fused gate weight (lane, 4*lane): column blocks [r | z | n_ih | n_hh].
    # x occupies packed-input lanes 0:H; rolled h lands in lanes H:2H (np.roll
    # convention) or lanes lane-H:lane (opposite convention) -> hidden rows are
    # written at BOTH offsets; the unused block multiplies exact zeros.
    w_comb = jnp.zeros((lane, 4 * lane), f32)
    for g in range(3):
        wi = w_ih[g * H:(g + 1) * H].T                   # (H, H): x -> gate g
        wh = w_hh[g * H:(g + 1) * H].T                   # (H, H): h -> gate g
        if g < 2:   # r, z: x- and h-contributions summed in one column block
            col = g * lane
            w_comb = w_comb.at[0:H, col:col + H].set(wi)
            w_comb = w_comb.at[H:2 * H, col:col + H].set(wh)
            w_comb = w_comb.at[lane - H:lane, col:col + H].set(wh)
        else:       # n: input part (block 2) kept separate from hidden part (block 3)
            w_comb = w_comb.at[0:H, 2 * lane:2 * lane + H].set(wi)
            w_comb = w_comb.at[H:2 * H, 3 * lane:3 * lane + H].set(wh)
            w_comb = w_comb.at[lane - H:lane, 3 * lane:3 * lane + H].set(wh)

    w_out_pack = jnp.zeros((lane, lane), f32).at[:H, :V].set(params["w_out"].T)

    b_ih, b_hh = params["b_ih"], params["b_hh"]
    b_pack = jnp.zeros((8, lane), f32)
    b_pack = b_pack.at[0, :H].set(b_ih[0:H] + b_hh[0:H])            # r
    b_pack = b_pack.at[1, :H].set(b_ih[H:2 * H] + b_hh[H:2 * H])    # z
    b_pack = b_pack.at[2, :H].set(b_ih[2 * H:3 * H])                # n (input)
    b_pack = b_pack.at[3, :H].set(b_hh[2 * H:3 * H])                # n (hidden)
    b_out_row = jnp.full((lane,), BIG_NEG, f32).at[:V].set(params["b_out"])
    b_pack = b_pack.at[4, :].set(b_out_row)                         # out (+vocab mask)

    return dict(emb=emb, w_comb=w_comb, w_out=w_out_pack, b=b_pack)


# -----------------------------------------------------------------------------
# Wrapper: single pallas_call (grid=()) runs the whole T-step decode
# -----------------------------------------------------------------------------
def _decoder_decode(tokens, hidden0, prepped, n_layers=N_LAYERS):
    """tokens: (T,) int32 decoder inputs; hidden0: (1, 1, HIDDEN).
    Returns (log_probs (T, OUTPUT), final hidden (1, 1, HIDDEN))."""
    T = int(tokens.shape[0])
    T_pad = max(8, ((T + 7) // 8) * 8)

    # Pre-gather embeddings in the wrapper (tokens known before launch).
    x_all = jnp.zeros((T_pad, LANE), jnp.float32).at[:T].set(
        jnp.take(prepped["emb"], tokens.astype(jnp.int32), axis=0))

    h0 = jnp.zeros((1, LANE), jnp.float32).at[:, :HIDDEN].set(
        hidden0.reshape(1, HIDDEN).astype(jnp.float32))

    vmem = pl.BlockSpec(memory_space=pltpu.MemorySpace.VMEM)
    logp_pad, h_hist = pl.pallas_call(
        functools.partial(decoder_kernel, n_layers, T),
        out_shape=(jax.ShapeDtypeStruct((T_pad, LANE), jnp.float32),   # log-probs
                   jax.ShapeDtypeStruct((T_pad, LANE), jnp.float32)),  # hidden history
        in_specs=[vmem] * 5,                  # weights/state resident in VMEM (1 DMA each)
        out_specs=(vmem, vmem),
    )(x_all, prepped["w_comb"], prepped["w_out"], prepped["b"], h0)

    logp = logp_pad[:T, :OUTPUT]                         # (T, OUTPUT)
    h_final = h_hist[T - 1, :HIDDEN].reshape(1, 1, HIDDEN)
    return logp, h_final


decoder_decode = jax.jit(_decoder_decode, static_argnames=("n_layers",))


# -----------------------------------------------------------------------------
# Pure-JAX reference mirroring the PyTorch forward, applied T times
# -----------------------------------------------------------------------------
def decoder_forward_ref(tokens, hidden0, params, n_layers=N_LAYERS):
    H = HIDDEN
    h = hidden0.reshape(1, H)
    logps = []
    for t in range(tokens.shape[0]):
        x = params["embedding"][tokens[t]].reshape(1, H)
        for _ in range(n_layers):
            x = jnp.maximum(x, 0.0)
            gi = x @ params["w_ih"].T + params["b_ih"]
            gh = h @ params["w_hh"].T + params["b_hh"]
            r = jax.nn.sigmoid(gi[:, 0:H] + gh[:, 0:H])
            z = jax.nn.sigmoid(gi[:, H:2 * H] + gh[:, H:2 * H])
            n = jnp.tanh(gi[:, 2 * H:] + r * gh[:, 2 * H:])
            h = (1.0 - z) * n + z * h
            x = h
        logits = h @ params["w_out"].T + params["b_out"]
        logps.append(jax.nn.log_softmax(logits, axis=-1))
    return jnp.concatenate(logps, axis=0), h.reshape(1, 1, H)


if __name__ == "__main__":
    root = jax.random.PRNGKey(0)
    k_params, k_tok, k_h = jax.random.split(root, 3)

    params = init_params(k_params)
    prepped = prepare_params(params)            # one-time packing (hoisted glue)

    tokens = jax.random.randint(k_tok, (SEQ_LEN,), 0, OUTPUT, dtype=jnp.int32)
    hidden0 = 0.1 * jax.random.normal(k_h, (1, 1, HIDDEN), jnp.float32)

    logp, h_final = decoder_decode(tokens, hidden0, prepped, n_layers=N_LAYERS)
    jax.block_until_ready((logp, h_final))

    logp_ref, h_final_ref = decoder_forward_ref(tokens, hidden0, params,
                                                n_layers=N_LAYERS)
    np.testing.assert_allclose(np.asarray(logp), np.asarray(logp_ref),
                               rtol=1e-5, atol=1e-5)
    np.testing.assert_allclose(np.asarray(h_final), np.asarray(h_final_ref),
                               rtol=1e-5, atol=1e-5)

    print("KERNEL_OK")
</pallas_src>

<mosaic_0001>
module attributes {stable_mosaic.version = 11 : i64} {
  func.func @decoder_kernel(%arg0: memref<8x128xf32, #tpu.memory_space<vmem>>, %arg1: memref<128x512xf32, #tpu.memory_space<vmem>>, %arg2: memref<128x128xf32, #tpu.memory_space<vmem>>, %arg3: memref<8x128xf32, #tpu.memory_space<vmem>>, %arg4: memref<1x128xf32, #tpu.memory_space<vmem>>, %arg5: memref<8x128xf32, #tpu.memory_space<vmem>>, %arg6: memref<8x128xf32, #tpu.memory_space<vmem>>) attributes {dimension_semantics = [], scalar_prefetch = 0 : i64, scratch_operands = 0 : i64, tpu.core_type = #tpu.core_type<tc>} {
    %c0 = arith.constant 0 : index
    %c0_0 = arith.constant 0 : index
    %0 = vector.load %arg1[%c0, %c0_0] : memref<128x512xf32, #tpu.memory_space<vmem>>, vector<128x512xf32>
    %c0_1 = arith.constant 0 : index
    %c0_2 = arith.constant 0 : index
    %1 = vector.load %arg3[%c0_1, %c0_2] : memref<8x128xf32, #tpu.memory_space<vmem>>, vector<1x128xf32>
    %c1 = arith.constant 1 : index
    %c0_3 = arith.constant 0 : index
    %2 = vector.load %arg3[%c1, %c0_3] : memref<8x128xf32, #tpu.memory_space<vmem>>, vector<1x128xf32>
    %c2 = arith.constant 2 : index
    %c0_4 = arith.constant 0 : index
    %3 = vector.load %arg3[%c2, %c0_4] : memref<8x128xf32, #tpu.memory_space<vmem>>, vector<1x128xf32>
    %c3 = arith.constant 3 : index
    %c0_5 = arith.constant 0 : index
    %4 = vector.load %arg3[%c3, %c0_5] : memref<8x128xf32, #tpu.memory_space<vmem>>, vector<1x128xf32>
    %c4 = arith.constant 4 : index
    %c0_6 = arith.constant 0 : index
    %5 = vector.load %arg3[%c4, %c0_6] : memref<8x128xf32, #tpu.memory_space<vmem>>, vector<1x128xf32>
    %cst = arith.constant 0.000000e+00 : f32
    %6 = vector.broadcast %cst : f32 to vector<8x128xf32>
    %c0_7 = arith.constant 0 : index
    %c0_8 = arith.constant 0 : index
    %7 = vector.load %arg6[%c0_7, %c0_8] : memref<8x128xf32, #tpu.memory_space<vmem>>, vector<8x128xf32>
    tpu.vector_store %arg6[%c0_7, %c0_8], %6 {strides = array<i32>} : memref<8x128xf32, #tpu.memory_space<vmem>>, vector<8x128xf32>,
    %c0_9 = arith.constant 0 : index
    %c0_10 = arith.constant 0 : index
    %8 = vector.load %arg4[%c0_9, %c0_10] : memref<1x128xf32, #tpu.memory_space<vmem>>, vector<1x128xf32>
    %c0_i32 = arith.constant 0 : i32
    %9 = arith.index_cast %c0_i32 : i32 to index
    %c0_11 = arith.constant 0 : index
    %10 = vector.load %arg0[%9, %c0_11] : memref<8x128xf32, #tpu.memory_space<vmem>>, vector<1x128xf32>
    %cst_12 = arith.constant 0.000000e+00 : f32
    %11 = vector.broadcast %cst_12 : f32 to vector<1x128xf32>
    %12 = arith.maximumf %10, %11 : vector<1x128xf32>
    %c32_i32 = arith.constant 32 : i32
    %13 = tpu.dynamic_rotate %8 by %c32_i32 dim 1 : vector<1x128xf32>, i32 -> vector<1x128xf32>
    %14 = arith.addf %12, %13 : vector<1x128xf32>
    %cst_13 = arith.constant dense<0.000000e+00> : vector<1x512xf32>
    %15 = tpu.matmul %14, %0, %cst_13 {dimension_numbers = #tpu.dot_dimension_numbers<[1], [0], [0], [1], [0, 0, 1, 1], [], []>} : vector<1x128xf32>, vector<128x512xf32>, vector<1x512xf32> -> vector<1x512xf32>
    %16 = vector.extract_strided_slice %15 {offsets = [0, 0], sizes = [1, 128], strides = [1, 1]} : vector<1x512xf32> to vector<1x128xf32>
    %17 = arith.addf %16, %1 : vector<1x128xf32>
    %18 = arith.negf %17 : vector<1x128xf32>
    %19 = math.exp %18 : vector<1x128xf32>
    %cst_14 = arith.constant 1.000000e+00 : f32
    %20 = vector.broadcast %cst_14 : f32 to vector<1x128xf32>
    %21 = arith.addf %20, %19 : vector<1x128xf32>
    %22 = arith.divf %20, %21 : vector<1x128xf32>
    %23 = vector.extract_strided_slice %15 {offsets = [0, 128], sizes = [1, 128], strides = [1, 1]} : vector<1x512xf32> to vector<1x128xf32>
    %24 = arith.addf %23, %2 : vector<1x128xf32>
    %25 = arith.negf %24 : vector<1x128xf32>
    %26 = math.exp %25 : vector<1x128xf32>
    %cst_15 = arith.constant 1.000000e+00 : f32
    %27 = vector.broadcast %cst_15 : f32 to vector<1x128xf32>
    %28 = arith.addf %27, %26 : vector<1x128xf32>
    %29 = arith.divf %27, %28 : vector<1x128xf32>
    %30 = vector.extract_strided_slice %15 {offsets = [0, 256], sizes = [1, 128], strides = [1, 1]} : vector<1x512xf32> to vector<1x128xf32>
    %31 = arith.addf %30, %3 : vector<1x128xf32>
    %32 = vector.extract_strided_slice %15 {offsets = [0, 384], sizes = [1, 128], strides = [1, 1]} : vector<1x512xf32> to vector<1x128xf32>
    %33 = arith.addf %32, %4 : vector<1x128xf32>
    %34 = arith.mulf %22, %33 : vector<1x128xf32>
    %35 = arith.addf %31, %34 : vector<1x128xf32>
    %36 = math.tanh %35 : vector<1x128xf32>
    %cst_16 = arith.constant 1.000000e+00 : f32
    %37 = vector.broadcast %cst_16 : f32 to vector<1x128xf32>
    %38 = arith.subf %37, %29 : vector<1x128xf32>
    %39 = arith.mulf %38, %36 : vector<1x128xf32>
    %40 = arith.mulf %29, %8 : vector<1x128xf32>
    %41 = arith.addf %39, %40 : vector<1x128xf32>
    %42 = arith.index_cast %c0_i32 : i32 to index
    %c0_17 = arith.constant 0 : index
    %43 = vector.load %arg6[%42, %c0_17] : memref<8x128xf32, #tpu.memory_space<vmem>>, vector<1x128xf32>
    tpu.vector_store %arg6[%42, %c0_17], %41 {strides = array<i32>} : memref<8x128xf32, #tpu.memory_space<vmem>>, vector<1x128xf32>,
    %c1_i32 = arith.constant 1 : i32
    %44 = arith.index_cast %c1_i32 : i32 to index
    %c0_18 = arith.constant 0 : index
    %45 = vector.load %arg0[%44, %c0_18] : memref<8x128xf32, #tpu.memory_space<vmem>>, vector<1x128xf32>
    %cst_19 = arith.constant 0.000000e+00 : f32
    %46 = vector.broadcast %cst_19 : f32 to vector<1x128xf32>
    %47 = arith.maximumf %45, %46 : vector<1x128xf32>
    %c32_i32_20 = arith.constant 32 : i32
    %48 = tpu.dynamic_rotate %41 by %c32_i32_20 dim 1 : vector<1x128xf32>, i32 -> vector<1x128xf32>
    %49 = arith.addf %47, %48 : vector<1x128xf32>
    %cst_21 = arith.constant dense<0.000000e+00> : vector<1x512xf32>
    %50 = tpu.matmul %49, %0, %cst_21 {dimension_numbers = #tpu.dot_dimension_numbers<[1], [0], [0], [1], [0, 0, 1, 1], [], []>} : vector<1x128xf32>, vector<128x512xf32>, vector<1x512xf32> -> vector<1x512xf32>
    %51 = vector.extract_strided_slice %50 {offsets = [0, 0], sizes = [1, 128], strides = [1, 1]} : vector<1x512xf32> to vector<1x128xf32>
    %52 = arith.addf %51, %1 : vector<1x128xf32>
    %53 = arith.negf %52 : vector<1x128xf32>
    %54 = math.exp %53 : vector<1x128xf32>
    %cst_22 = arith.constant 1.000000e+00 : f32
    %55 = vector.broadcast %cst_22 : f32 to vector<1x128xf32>
    %56 = arith.addf %55, %54 : vector<1x128xf32>
    %57 = arith.divf %55, %56 : vector<1x128xf32>
    %58 = vector.extract_strided_slice %50 {offsets = [0, 128], sizes = [1, 128], strides = [1, 1]} : vector<1x512xf32> to vector<1x128xf32>
    %59 = arith.addf %58, %2 : vector<1x128xf32>
    %60 = arith.negf %59 : vector<1x128xf32>
    %61 = math.exp %60 : vector<1x128xf32>
    %cst_23 = arith.constant 1.000000e+00 : f32
    %62 = vector.broadcast %cst_23 : f32 to vector<1x128xf32>
    %63 = arith.addf %62, %61 : vector<1x128xf32>
    %64 = arith.divf %62, %63 : vector<1x128xf32>
    %65 = vector.extract_strided_slice %50 {offsets = [0, 256], sizes = [1, 128], strides = [1, 1]} : vector<1x512xf32> to vector<1x128xf32>
    %66 = arith.addf %65, %3 : vector<1x128xf32>
    %67 = vector.extract_strided_slice %50 {offsets = [0, 384], sizes = [1, 128], strides = [1, 1]} : vector<1x512xf32> to vector<1x128xf32>
    %68 = arith.addf %67, %4 : vector<1x128xf32>
    %69 = arith.mulf %57, %68 : vector<1x128xf32>
    %70 = arith.addf %66, %69 : vector<1x128xf32>
    %71 = math.tanh %70 : vector<1x128xf32>
    %cst_24 = arith.constant 1.000000e+00 : f32
    %72 = vector.broadcast %cst_24 : f32 to vector<1x128xf32>
    %73 = arith.subf %72, %64 : vector<1x128xf32>
    %74 = arith.mulf %73, %71 : vector<1x128xf32>
    %75 = arith.mulf %64, %41 : vector<1x128xf32>
    %76 = arith.addf %74, %75 : vector<1x128xf32>
    %77 = arith.index_cast %c1_i32 : i32 to index
    %c0_25 = arith.constant 0 : index
    %78 = vector.load %arg6[%77, %c0_25] : memref<8x128xf32, #tpu.memory_space<vmem>>, vector<1x128xf32>
    tpu.vector_store %arg6[%77, %c0_25], %76 {strides = array<i32>} : memref<8x128xf32, #tpu.memory_space<vmem>>, vector<1x128xf32>,
    %c2_i32 = arith.constant 2 : i32
    %79 = arith.index_cast %c2_i32 : i32 to index
    %c0_26 = arith.constant 0 : index
    %80 = vector.load %arg0[%79, %c0_26] : memref<8x128xf32, #tpu.memory_space<vmem>>, vector<1x128xf32>
    %cst_27 = arith.constant 0.000000e+00 : f32
    %81 = vector.broadcast %cst_27 : f32 to vector<1x128xf32>
    %82 = arith.maximumf %80, %81 : vector<1x128xf32>
    %c32_i32_28 = arith.constant 32 : i32
    %83 = tpu.dynamic_rotate %76 by %c32_i32_28 dim 1 : vector<1x128xf32>, i32 -> vector<1x128xf32>
    %84 = arith.addf %82, %83 : vector<1x128xf32>
    %cst_29 = arith.constant dense<0.000000e+00> : vector<1x512xf32>
    %85 = tpu.matmul %84, %0, %cst_29 {dimension_numbers = #tpu.dot_dimension_numbers<[1], [0], [0], [1], [0, 0, 1, 1], [], []>} : vector<1x128xf32>, vector<128x512xf32>, vector<1x512xf32> -> vector<1x512xf32>
    %86 = vector.extract_strided_slice %85 {offsets = [0, 0], sizes = [1, 128], strides = [1, 1]} : vector<1x512xf32> to vector<1x128xf32>
    %87 = arith.addf %86, %1 : vector<1x128xf32>
    %88 = arith.negf %87 : vector<1x128xf32>
    %89 = math.exp %88 : vector<1x128xf32>
    %cst_30 = arith.constant 1.000000e+00 : f32
    %90 = vector.broadcast %cst_30 : f32 to vector<1x128xf32>
    %91 = arith.addf %90, %89 : vector<1x128xf32>
    %92 = arith.divf %90, %91 : vector<1x128xf32>
    %93 = vector.extract_strided_slice %85 {offsets = [0, 128], sizes = [1, 128], strides = [1, 1]} : vector<1x512xf32> to vector<1x128xf32>
    %94 = arith.addf %93, %2 : vector<1x128xf32>
    %95 = arith.negf %94 : vector<1x128xf32>
    %96 = math.exp %95 : vector<1x128xf32>
    %cst_31 = arith.constant 1.000000e+00 : f32
    %97 = vector.broadcast %cst_31 : f32 to vector<1x128xf32>
    %98 = arith.addf %97, %96 : vector<1x128xf32>
    %99 = arith.divf %97, %98 : vector<1x128xf32>
    %100 = vector.extract_strided_slice %85 {offsets = [0, 256], sizes = [1, 128], strides = [1, 1]} : vector<1x512xf32> to vector<1x128xf32>
    %101 = arith.addf %100, %3 : vector<1x128xf32>
    %102 = vector.extract_strided_slice %85 {offsets = [0, 384], sizes = [1, 128], strides = [1, 1]} : vector<1x512xf32> to vector<1x128xf32>
    %103 = arith.addf %102, %4 : vector<1x128xf32>
    %104 = arith.mulf %92, %103 : vector<1x128xf32>
    %105 = arith.addf %101, %104 : vector<1x128xf32>
    %106 = math.tanh %105 : vector<1x128xf32>
    %cst_32 = arith.constant 1.000000e+00 : f32
    %107 = vector.broadcast %cst_32 : f32 to vector<1x128xf32>
    %108 = arith.subf %107, %99 : vector<1x128xf32>
    %109 = arith.mulf %108, %106 : vector<1x128xf32>
    %110 = arith.mulf %99, %76 : vector<1x128xf32>
    %111 = arith.addf %109, %110 : vector<1x128xf32>
    %112 = arith.index_cast %c2_i32 : i32 to index
    %c0_33 = arith.constant 0 : index
    %113 = vector.load %arg6[%112, %c0_33] : memref<8x128xf32, #tpu.memory_space<vmem>>, vector<1x128xf32>
    tpu.vector_store %arg6[%112, %c0_33], %111 {strides = array<i32>} : memref<8x128xf32, #tpu.memory_space<vmem>>, vector<1x128xf32>,
    %c3_i32 = arith.constant 3 : i32
    %114 = arith.index_cast %c3_i32 : i32 to index
    %c0_34 = arith.constant 0 : index
    %115 = vector.load %arg0[%114, %c0_34] : memref<8x128xf32, #tpu.memory_space<vmem>>, vector<1x128xf32>
    %cst_35 = arith.constant 0.000000e+00 : f32
    %116 = vector.broadcast %cst_35 : f32 to vector<1x128xf32>
    %117 = arith.maximumf %115, %116 : vector<1x128xf32>
    %c32_i32_36 = arith.constant 32 : i32
    %118 = tpu.dynamic_rotate %111 by %c32_i32_36 dim 1 : vector<1x128xf32>, i32 -> vector<1x128xf32>
    %119 = arith.addf %117, %118 : vector<1x128xf32>
    %cst_37 = arith.constant dense<0.000000e+00> : vector<1x512xf32>
    %120 = tpu.matmul %119, %0, %cst_37 {dimension_numbers = #tpu.dot_dimension_numbers<[1], [0], [0], [1], [0, 0, 1, 1], [], []>} : vector<1x128xf32>, vector<128x512xf32>, vector<1x512xf32> -> vector<1x512xf32>
    %121 = vector.extract_strided_slice %120 {offsets = [0, 0], sizes = [1, 128], strides = [1, 1]} : vector<1x512xf32> to vector<1x128xf32>
    %122 = arith.addf %121, %1 : vector<1x128xf32>
    %123 = arith.negf %122 : vector<1x128xf32>
    %124 = math.exp %123 : vector<1x128xf32>
    %cst_38 = arith.constant 1.000000e+00 : f32
    %125 = vector.broadcast %cst_38 : f32 to vector<1x128xf32>
    %126 = arith.addf %125, %124 : vector<1x128xf32>
    %127 = arith.divf %125, %126 : vector<1x128xf32>
    %128 = vector.extract_strided_slice %120 {offsets = [0, 128], sizes = [1, 128], strides = [1, 1]} : vector<1x512xf32> to vector<1x128xf32>
    %129 = arith.addf %128, %2 : vector<1x128xf32>
    %130 = arith.negf %129 : vector<1x128xf32>
    %131 = math.exp %130 : vector<1x128xf32>
    %cst_39 = arith.constant 1.000000e+00 : f32
    %132 = vector.broadcast %cst_39 : f32 to vector<1x128xf32>
    %133 = arith.addf %132, %131 : vector<1x128xf32>
    %134 = arith.divf %132, %133 : vector<1x128xf32>
    %135 = vector.extract_strided_slice %120 {offsets = [0, 256], sizes = [1, 128], strides = [1, 1]} : vector<1x512xf32> to vector<1x128xf32>
    %136 = arith.addf %135, %3 : vector<1x128xf32>
    %137 = vector.extract_strided_slice %120 {offsets = [0, 384], sizes = [1, 128], strides = [1, 1]} : vector<1x512xf32> to vector<1x128xf32>
    %138 = arith.addf %137, %4 : vector<1x128xf32>
    %139 = arith.mulf %127, %138 : vector<1x128xf32>
    %140 = arith.addf %136, %139 : vector<1x128xf32>
    %141 = math.tanh %140 : vector<1x128xf32>
    %cst_40 = arith.constant 1.000000e+00 : f32
    %142 = vector.broadcast %cst_40 : f32 to vector<1x128xf32>
    %143 = arith.subf %142, %134 : vector<1x128xf32>
    %144 = arith.mulf %143, %141 : vector<1x128xf32>
    %145 = arith.mulf %134, %111 : vector<1x128xf32>
    %146 = arith.addf %144, %145 : vector<1x128xf32>
    %147 = arith.index_cast %c3_i32 : i32 to index
    %c0_41 = arith.constant 0 : index
    %148 = vector.load %arg6[%147, %c0_41] : memref<8x128xf32, #tpu.memory_space<vmem>>, vector<1x128xf32>
    tpu.vector_store %arg6[%147, %c0_41], %146 {strides = array<i32>} : memref<8x128xf32, #tpu.memory_space<vmem>>, vector<1x128xf32>,
    %c4_i32 = arith.constant 4 : i32
    %149 = arith.index_cast %c4_i32 : i32 to index
    %c0_42 = arith.constant 0 : index
    %150 = vector.load %arg0[%149, %c0_42] : memref<8x128xf32, #tpu.memory_space<vmem>>, vector<1x128xf32>
    %cst_43 = arith.constant 0.000000e+00 : f32
    %151 = vector.broadcast %cst_43 : f32 to vector<1x128xf32>
    %152 = arith.maximumf %150, %151 : vector<1x128xf32>
    %c32_i32_44 = arith.constant 32 : i32
    %153 = tpu.dynamic_rotate %146 by %c32_i32_44 dim 1 : vector<1x128xf32>, i32 -> vector<1x128xf32>
    %154 = arith.addf %152, %153 : vector<1x128xf32>
    %cst_45 = arith.constant dense<0.000000e+00> : vector<1x512xf32>
    %155 = tpu.matmul %154, %0, %cst_45 {dimension_numbers = #tpu.dot_dimension_numbers<[1], [0], [0], [1], [0, 0, 1, 1], [], []>} : vector<1x128xf32>, vector<128x512xf32>, vector<1x512xf32> -> vector<1x512xf32>
    %156 = vector.extract_strided_slice %155 {offsets = [0, 0], sizes = [1, 128], strides = [1, 1]} : vector<1x512xf32> to vector<1x128xf32>
    %157 = arith.addf %156, %1 : vector<1x128xf32>
    %158 = arith.negf %157 : vector<1x128xf32>
    %159 = math.exp %158 : vector<1x128xf32>
    %cst_46 = arith.constant 1.000000e+00 : f32
    %160 = vector.broadcast %cst_46 : f32 to vector<1x128xf32>
    %161 = arith.addf %160, %159 : vector<1x128xf32>
    %162 = arith.divf %160, %161 : vector<1x128xf32>
    %163 = vector.extract_strided_slice %155 {offsets = [0, 128], sizes = [1, 128], strides = [1, 1]} : vector<1x512xf32> to vector<1x128xf32>
    %164 = arith.addf %163, %2 : vector<1x128xf32>
    %165 = arith.negf %164 : vector<1x128xf32>
    %166 = math.exp %165 : vector<1x128xf32>
    %cst_47 = arith.constant 1.000000e+00 : f32
    %167 = vector.broadcast %cst_47 : f32 to vector<1x128xf32>
    %168 = arith.addf %167, %166 : vector<1x128xf32>
    %169 = arith.divf %167, %168 : vector<1x128xf32>
    %170 = vector.extract_strided_slice %155 {offsets = [0, 256], sizes = [1, 128], strides = [1, 1]} : vector<1x512xf32> to vector<1x128xf32>
    %171 = arith.addf %170, %3 : vector<1x128xf32>
    %172 = vector.extract_strided_slice %155 {offsets = [0, 384], sizes = [1, 128], strides = [1, 1]} : vector<1x512xf32> to vector<1x128xf32>
    %173 = arith.addf %172, %4 : vector<1x128xf32>
    %174 = arith.mulf %162, %173 : vector<1x128xf32>
    %175 = arith.addf %171, %174 : vector<1x128xf32>
    %176 = math.tanh %175 : vector<1x128xf32>
    %cst_48 = arith.constant 1.000000e+00 : f32
    %177 = vector.broadcast %cst_48 : f32 to vector<1x128xf32>
    %178 = arith.subf %177, %169 : vector<1x128xf32>
    %179 = arith.mulf %178, %176 : vector<1x128xf32>
    %180 = arith.mulf %169, %146 : vector<1x128xf32>
    %181 = arith.addf %179, %180 : vector<1x128xf32>
    %182 = arith.index_cast %c4_i32 : i32 to index
    %c0_49 = arith.constant 0 : index
    %183 = vector.load %arg6[%182, %c0_49] : memref<8x128xf32, #tpu.memory_space<vmem>>, vector<1x128xf32>
    tpu.vector_store %arg6[%182, %c0_49], %181 {strides = array<i32>} : memref<8x128xf32, #tpu.memory_space<vmem>>, vector<1x128xf32>,
    %c5_i32 = arith.constant 5 : i32
    %184 = arith.index_cast %c5_i32 : i32 to index
    %c0_50 = arith.constant 0 : index
    %185 = vector.load %arg0[%184, %c0_50] : memref<8x128xf32, #tpu.memory_space<vmem>>, vector<1x128xf32>
    %cst_51 = arith.constant 0.000000e+00 : f32
    %186 = vector.broadcast %cst_51 : f32 to vector<1x128xf32>
    %187 = arith.maximumf %185, %186 : vector<1x128xf32>
    %c32_i32_52 = arith.constant 32 : i32
    %188 = tpu.dynamic_rotate %181 by %c32_i32_52 dim 1 : vector<1x128xf32>, i32 -> vector<1x128xf32>
    %189 = arith.addf %187, %188 : vector<1x128xf32>
    %cst_53 = arith.constant dense<0.000000e+00> : vector<1x512xf32>
    %190 = tpu.matmul %189, %0, %cst_53 {dimension_numbers = #tpu.dot_dimension_numbers<[1], [0], [0], [1], [0, 0, 1, 1], [], []>} : vector<1x128xf32>, vector<128x512xf32>, vector<1x512xf32> -> vector<1x512xf32>
    %191 = vector.extract_strided_slice %190 {offsets = [0, 0], sizes = [1, 128], strides = [1, 1]} : vector<1x512xf32> to vector<1x128xf32>
    %192 = arith.addf %191, %1 : vector<1x128xf32>
    %193 = arith.negf %192 : vector<1x128xf32>
    %194 = math.exp %193 : vector<1x128xf32>
    %cst_54 = arith.constant 1.000000e+00 : f32
    %195 = vector.broadcast %cst_54 : f32 to vector<1x128xf32>
    %196 = arith.addf %195, %194 : vector<1x128xf32>
    %197 = arith.divf %195, %196 : vector<1x128xf32>
    %198 = vector.extract_strided_slice %190 {offsets = [0, 128], sizes = [1, 128], strides = [1, 1]} : vector<1x512xf32> to vector<1x128xf32>
    %199 = arith.addf %198, %2 : vector<1x128xf32>
    %200 = arith.negf %199 : vector<1x128xf32>
    %201 = math.exp %200 : vector<1x128xf32>
    %cst_55 = arith.constant 1.000000e+00 : f32
    %202 = vector.broadcast %cst_55 : f32 to vector<1x128xf32>
    %203 = arith.addf %202, %201 : vector<1x128xf32>
    %204 = arith.divf %202, %203 : vector<1x128xf32>
    %205 = vector.extract_strided_slice %190 {offsets = [0, 256], sizes = [1, 128], strides = [1, 1]} : vector<1x512xf32> to vector<1x128xf32>
    %206 = arith.addf %205, %3 : vector<1x128xf32>
    %207 = vector.extract_strided_slice %190 {offsets = [0, 384], sizes = [1, 128], strides = [1, 1]} : vector<1x512xf32> to vector<1x128xf32>
    %208 = arith.addf %207, %4 : vector<1x128xf32>
    %209 = arith.mulf %197, %208 : vector<1x128xf32>
    %210 = arith.addf %206, %209 : vector<1x128xf32>
    %211 = math.tanh %210 : vector<1x128xf32>
    %cst_56 = arith.constant 1.000000e+00 : f32
    %212 = vector.broadcast %cst_56 : f32 to vector<1x128xf32>
    %213 = arith.subf %212, %204 : vector<1x128xf32>
    %214 = arith.mulf %213, %211 : vector<1x128xf32>
    %215 = arith.mulf %204, %181 : vector<1x128xf32>
    %216 = arith.addf %214, %215 : vector<1x128xf32>
    %217 = arith.index_cast %c5_i32 : i32 to index
    %c0_57 = arith.constant 0 : index
    %218 = vector.load %arg6[%217, %c0_57] : memref<8x128xf32, #tpu.memory_space<vmem>>, vector<1x128xf32>
    tpu.vector_store %arg6[%217, %c0_57], %216 {strides = array<i32>} : memref<8x128xf32, #tpu.memory_space<vmem>>, vector<1x128xf32>,
    %c6_i32 = arith.constant 6 : i32
    %219 = arith.index_cast %c6_i32 : i32 to index
    %c0_58 = arith.constant 0 : index
    %220 = vector.load %arg0[%219, %c0_58] : memref<8x128xf32, #tpu.memory_space<vmem>>, vector<1x128xf32>
    %cst_59 = arith.constant 0.000000e+00 : f32
    %221 = vector.broadcast %cst_59 : f32 to vector<1x128xf32>
    %222 = arith.maximumf %220, %221 : vector<1x128xf32>
    %c32_i32_60 = arith.constant 32 : i32
    %223 = tpu.dynamic_rotate %216 by %c32_i32_60 dim 1 : vector<1x128xf32>, i32 -> vector<1x128xf32>
    %224 = arith.addf %222, %223 : vector<1x128xf32>
    %cst_61 = arith.constant dense<0.000000e+00> : vector<1x512xf32>
    %225 = tpu.matmul %224, %0, %cst_61 {dimension_numbers = #tpu.dot_dimension_numbers<[1], [0], [0], [1], [0, 0, 1, 1], [], []>} : vector<1x128xf32>, vector<128x512xf32>, vector<1x512xf32> -> vector<1x512xf32>
    %226 = vector.extract_strided_slice %225 {offsets = [0, 0], sizes = [1, 128], strides = [1, 1]} : vector<1x512xf32> to vector<1x128xf32>
    %227 = arith.addf %226, %1 : vector<1x128xf32>
    %228 = arith.negf %227 : vector<1x128xf32>
    %229 = math.exp %228 : vector<1x128xf32>
    %cst_62 = arith.constant 1.000000e+00 : f32
    %230 = vector.broadcast %cst_62 : f32 to vector<1x128xf32>
    %231 = arith.addf %230, %229 : vector<1x128xf32>
    %232 = arith.divf %230, %231 : vector<1x128xf32>
    %233 = vector.extract_strided_slice %225 {offsets = [0, 128], sizes = [1, 128], strides = [1, 1]} : vector<1x512xf32> to vector<1x128xf32>
    %234 = arith.addf %233, %2 : vector<1x128xf32>
    %235 = arith.negf %234 : vector<1x128xf32>
    %236 = math.exp %235 : vector<1x128xf32>
    %cst_63 = arith.constant 1.000000e+00 : f32
    %237 = vector.broadcast %cst_63 : f32 to vector<1x128xf32>
    %238 = arith.addf %237, %236 : vector<1x128xf32>
    %239 = arith.divf %237, %238 : vector<1x128xf32>
    %240 = vector.extract_strided_slice %225 {offsets = [0, 256], sizes = [1, 128], strides = [1, 1]} : vector<1x512xf32> to vector<1x128xf32>
    %241 = arith.addf %240, %3 : vector<1x128xf32>
    %242 = vector.extract_strided_slice %225 {offsets = [0, 384], sizes = [1, 128], strides = [1, 1]} : vector<1x512xf32> to vector<1x128xf32>
    %243 = arith.addf %242, %4 : vector<1x128xf32>
    %244 = arith.mulf %232, %243 : vector<1x128xf32>
    %245 = arith.addf %241, %244 : vector<1x128xf32>
    %246 = math.tanh %245 : vector<1x128xf32>
    %cst_64 = arith.constant 1.000000e+00 : f32
    %247 = vector.broadcast %cst_64 : f32 to vector<1x128xf32>
    %248 = arith.subf %247, %239 : vector<1x128xf32>
    %249 = arith.mulf %248, %246 : vector<1x128xf32>
    %250 = arith.mulf %239, %216 : vector<1x128xf32>
    %251 = arith.addf %249, %250 : vector<1x128xf32>
    %252 = arith.index_cast %c6_i32 : i32 to index
    %c0_65 = arith.constant 0 : index
    %253 = vector.load %arg6[%252, %c0_65] : memref<8x128xf32, #tpu.memory_space<vmem>>, vector<1x128xf32>
    tpu.vector_store %arg6[%252, %c0_65], %251 {strides = array<i32>} : memref<8x128xf32, #tpu.memory_space<vmem>>, vector<1x128xf32>,
    %c7_i32 = arith.constant 7 : i32
    %254 = arith.index_cast %c7_i32 : i32 to index
    %c0_66 = arith.constant 0 : index
    %255 = vector.load %arg0[%254, %c0_66] : memref<8x128xf32, #tpu.memory_space<vmem>>, vector<1x128xf32>
    %cst_67 = arith.constant 0.000000e+00 : f32
    %256 = vector.broadcast %cst_67 : f32 to vector<1x128xf32>
    %257 = arith.maximumf %255, %256 : vector<1x128xf32>
    %c32_i32_68 = arith.constant 32 : i32
    %258 = tpu.dynamic_rotate %251 by %c32_i32_68 dim 1 : vector<1x128xf32>, i32 -> vector<1x128xf32>
    %259 = arith.addf %257, %258 : vector<1x128xf32>
    %cst_69 = arith.constant dense<0.000000e+00> : vector<1x512xf32>
    %260 = tpu.matmul %259, %0, %cst_69 {dimension_numbers = #tpu.dot_dimension_numbers<[1], [0], [0], [1], [0, 0, 1, 1], [], []>} : vector<1x128xf32>, vector<128x512xf32>, vector<1x512xf32> -> vector<1x512xf32>
    %261 = vector.extract_strided_slice %260 {offsets = [0, 0], sizes = [1, 128], strides = [1, 1]} : vector<1x512xf32> to vector<1x128xf32>
    %262 = arith.addf %261, %1 : vector<1x128xf32>
    %263 = arith.negf %262 : vector<1x128xf32>
    %264 = math.exp %263 : vector<1x128xf32>
    %cst_70 = arith.constant 1.000000e+00 : f32
    %265 = vector.broadcast %cst_70 : f32 to vector<1x128xf32>
    %266 = arith.addf %265, %264 : vector<1x128xf32>
    %267 = arith.divf %265, %266 : vector<1x128xf32>
    %268 = vector.extract_strided_slice %260 {offsets = [0, 128], sizes = [1, 128], strides = [1, 1]} : vector<1x512xf32> to vector<1x128xf32>
    %269 = arith.addf %268, %2 : vector<1x128xf32>
    %270 = arith.negf %269 : vector<1x128xf32>
    %271 = math.exp %270 : vector<1x128xf32>
    %cst_71 = arith.constant 1.000000e+00 : f32
    %272 = vector.broadcast %cst_71 : f32 to vector<1x128xf32>
    %273 = arith.addf %272, %271 : vector<1x128xf32>
    %274 = arith.divf %272, %273 : vector<1x128xf32>
    %275 = vector.extract_strided_slice %260 {offsets = [0, 256], sizes = [1, 128], strides = [1, 1]} : vector<1x512xf32> to vector<1x128xf32>
    %276 = arith.addf %275, %3 : vector<1x128xf32>
    %277 = vector.extract_strided_slice %260 {offsets = [0, 384], sizes = [1, 128], strides = [1, 1]} : vector<1x512xf32> to vector<1x128xf32>
    %278 = arith.addf %277, %4 : vector<1x128xf32>
    %279 = arith.mulf %267, %278 : vector<1x128xf32>
    %280 = arith.addf %276, %279 : vector<1x128xf32>
    %281 = math.tanh %280 : vector<1x128xf32>
    %cst_72 = arith.constant 1.000000e+00 : f32
    %282 = vector.broadcast %cst_72 : f32 to vector<1x128xf32>
    %283 = arith.subf %282, %274 : vector<1x128xf32>
    %284 = arith.mulf %283, %281 : vector<1x128xf32>
    %285 = arith.mulf %274, %251 : vector<1x128xf32>
    %286 = arith.addf %284, %285 : vector<1x128xf32>
    %287 = arith.index_cast %c7_i32 : i32 to index
    %c0_73 = arith.constant 0 : index
    %288 = vector.load %arg6[%287, %c0_73] : memref<8x128xf32, #tpu.memory_space<vmem>>, vector<1x128xf32>
    tpu.vector_store %arg6[%287, %c0_73], %286 {strides = array<i32>} : memref<8x128xf32, #tpu.memory_space<vmem>>, vector<1x128xf32>,
    %c8_i32 = arith.constant 8 : i32
    %c0_74 = arith.constant 0 : index
    %c0_75 = arith.constant 0 : index
    %289 = vector.load %arg6[%c0_74, %c0_75] : memref<8x128xf32, #tpu.memory_space<vmem>>, vector<8x128xf32>
    %c0_76 = arith.constant 0 : index
    %c0_77 = arith.constant 0 : index
    %290 = vector.load %arg2[%c0_76, %c0_77] : memref<128x128xf32, #tpu.memory_space<vmem>>, vector<128x128xf32>
    %cst_78 = arith.constant dense<0.000000e+00> : vector<8x128xf32>
    %291 = tpu.matmul %289, %290, %cst_78 {dimension_numbers = #tpu.dot_dimension_numbers<[1], [0], [0], [1], [0, 0, 1, 1], [], []>} : vector<8x128xf32>, vector<128x128xf32>, vector<8x128xf32> -> vector<8x128xf32>
    %292 = vector.broadcast %5 : vector<1x128xf32> to vector<8x128xf32>
    %293 = arith.addf %291, %292 : vector<8x128xf32>
    %cst_79 = arith.constant dense<0xFF800000> : vector<8xf32>
    %294 = vector.multi_reduction <maximumf>, %293, %cst_79 [1] : vector<8x128xf32> to vector<8xf32>
    %295 = vector.shape_cast %294 : vector<8xf32> to vector<8x1xf32>
    %296 = vector.broadcast %295 : vector<8x1xf32> to vector<8x128xf32>
    %297 = arith.subf %293, %296 : vector<8x128xf32>
    %298 = math.exp %297 : vector<8x128xf32>
    %cst_80 = arith.constant dense<0.000000e+00> : vector<8xf32>
    %299 = vector.multi_reduction <add>, %298, %cst_80 [1] : vector<8x128xf32> to vector<8xf32>
    %300 = vector.shape_cast %299 : vector<8xf32> to vector<8x1xf32>
    %301 = math.log %300 : vector<8x1xf32>
    %302 = arith.addf %301, %295 : vector<8x1xf32>
    %303 = vector.broadcast %302 : vector<8x1xf32> to vector<8x128xf32>
    %304 = arith.subf %293, %303 : vector<8x128xf32>
    %c0_81 = arith.constant 0 : index
    %c0_82 = arith.constant 0 : index
    %305 = vector.load %arg5[%c0_81, %c0_82] : memref<8x128xf32, #tpu.memory_space<vmem>>, vector<8x128xf32>
    tpu.vector_store %arg5[%c0_81, %c0_82], %304 {strides = array<i32>} : memref<8x128xf32, #tpu.memory_space<vmem>>, vector<8x128xf32>,
    return
  }
}

</mosaic_0001>

<bundles_post_ra>
// kernel: _decoder_decode.1
= control target key start
LH: loop header
LB: loop body
LE: loop exit
PB: predicated region body
PF: predicated region fallthrough
CT: control target
= control target key end

     0   :  { %12 = vsyncpa [#allocation3], 0  ;;  %s2533_s0 = inlined_call_operand.vmem [shape: f32[8,128], index: 0, kind: input, shape index: {}]   ;;  %s2534_s1 = inlined_call_operand.hbm [shape: f32[128,512], index: 1, kind: input, shape index: {}]   ;;  %s2535_s2 = inlined_call_operand.hbm [shape: f32[128,128], index: 2, kind: input, shape index: {}]   ;;  %s2536_s3 = inlined_call_operand.vmem [shape: f32[8,128], index: 3, kind: input, shape index: {}]   ;;  %s2537_s4 = inlined_call_operand.vmem [shape: f32[1,128], index: 4, kind: input, shape index: {}]   ;;  %s2538_s5 = inlined_call_operand.hbm [shape: f32[8,128], index: 5, kind: output, shape index: {0}]   ;;  %s2539_s6 = inlined_call_operand.vmem [shape: f32[8,128], index: 6, kind: output, shape index: {1}]  }
   0x1   :  { %13 = vsyncpa [#allocation6], 0 }
   0x2   :  { %14 = vsyncpa [#allocation4], 0  ;;  %s21_s23 = sshll.u32 %s2534_s1, 4  ;;  %s1533_s24 = smov [#allocation2]   ;;  %s22_s23 = int_to_ptr.hbm [resolvable:$true] %s21_s23 }
   0x3   :  { %s23_s25 = sshll.u32 %s1533_s24, 4  ;;  %s34_s28 = sshll.u32 %s2535_s2, 4  ;;  %s24_s25 = int_to_ptr.vmem [resolvable:$true] %s23_s25  ;;  %s35_s28 = int_to_ptr.hbm [resolvable:$true] %s34_s28 }
   0x4   :  { %s1534_s29 = smov 512   ;;  %s1535_s30 = smov 32  }
   0x5   :  { %29 = dma.hbm_to_vmem [thread:$0]  %s22_s23, 8192, %s24_s25, [#allocation3], %s1534_s29, %s1534_s29, %s1535_s30  }
   0x6   :  { %s1536_s7 = smov [#allocation5]   ;;  %s1537_s9 = smov 128  }
   0x7   :  { %s36_s8 = sshll.u32 %s1536_s7, 4  ;;  %s1538_s10 = smov 8   ;;  %s37_s8 = int_to_ptr.vmem [resolvable:$true] %s36_s8 }
   0x8   :  { %42 = dma.hbm_to_vmem [thread:$0]  %s35_s28, 2048, %s37_s8, [#allocation6], %s1537_s9, %s1537_s9, %s1538_s10  }
   0x9   :  { %1527 = dma.done.wait [#allocation3], 8192  }
   0xa   :  { %1528 = vsyncadd [#allocation3], 4294959104 }
   0xb   :  { %1529 = dma.done.wait [#allocation6], 2048  }
   0xc   :  { %1530 = vsyncadd [#allocation6], 4294965248  ;;  %v1586_v0 = vld [vmem:[%s2537_s4] sm:$0x1]  ;;  %v1590_v2 = vld [vmem:[#allocation2 + $0x1e8] sm:$0xff]  ;;  %s1540_s2 = smov [#allocation7]  }
   0xd   :  { %2651 = vst [vmem:[#allocation11_spill] sm:$0xff] %v1586_v0  ;;  %v1588_v1 = vld [vmem:[#allocation2 + $0x1e0] sm:$0xff]  ;;  %128 = vrot.lane.b32.xlu0 %v1586_v0, %s1535_s30  ;;  %v1595_v3 = vld [vmem:[#allocation2 + $0x1f0] sm:$0xff]  ;;  %v1597_v4 = vld [vmem:[#allocation2 + $0x1f8] sm:$0xff]  ;;  %151 = vmatpush.msra.mxu1 %v1590_v2  ;;  %s1263_s13 = sshll.u32 %s2538_s5, 4  ;;  %s1264_s13 = int_to_ptr.hbm [resolvable:$true] %s1263_s13 }
   0xe   :  { %131 = vmatpush.msra.mxu0 %v1588_v1  ;;  %v1599_v5 = vld [vmem:[#allocation2 + $0x1c0] sm:$0xff]  ;;  %171 = vmatpush.msra.mxu2 %v1595_v3  ;;  %v1603_v6 = vld [vmem:[#allocation2 + $0x1c8] sm:$0xff]  ;;  %v1605_v7 = vld [vmem:[#allocation2 + $0x1d0] sm:$0xff] }
   0xf   :  { %v1607_v8 = vld [vmem:[#allocation2 + $0x1d8] sm:$0xff]  ;;  %191 = vmatpush.msra.mxu3 %v1597_v4  ;;  %v1611_v9 = vld [vmem:[#allocation2 + $0x1a0] sm:$0xff]  ;;  %v1613_v10 = vld [vmem:[#allocation2 + $0x1a8] sm:$0xff]  ;;  %152 = vmatpush.msra.mxu1 %v1603_v6 }
  0x10   :  { %132 = vmatpush.msra.mxu0 %v1599_v5  ;;  %v1615_v11 = vld [vmem:[#allocation2 + $0x1b0] sm:$0xff]  ;;  %172 = vmatpush.msra.mxu2 %v1605_v7  ;;  %v1619_v12 = vld [vmem:[#allocation2 + $0x1b8] sm:$0xff]  ;;  %v1621_v13 = vld [vmem:[#allocation2 + $0x180] sm:$0xff] }
  0x11   :  { %192 = vmatpush.msra.mxu3 %v1607_v8  ;;  %v1625_v14 = vld [vmem:[#allocation2 + $0x188] sm:$0xff]  ;;  %v1627_v15 = vld [vmem:[#allocation2 + $0x190] sm:$0xff]  ;;  %153 = vmatpush.msra.mxu1 %v1613_v10  ;;  %v1631_v16 = vld [vmem:[#allocation2 + $0x198] sm:$0xff] }
  0x12   :  { %133 = vmatpush.msra.mxu0 %v1611_v9  ;;  %173 = vmatpush.msra.mxu2 %v1615_v11  ;;  %v1633_v17 = vld [vmem:[#allocation2 + $0x160] sm:$0xff]  ;;  %v1637_v18 = vld [vmem:[#allocation2 + $0x168] sm:$0xff]  ;;  %v1639_v19 = vld [vmem:[#allocation2 + $0x170] sm:$0xff] }
  0x13   :  { %193 = vmatpush.msra.mxu3 %v1619_v12  ;;  %154 = vmatpush.msra.mxu1 %v1625_v14  ;;  %v1643_v20 = vld [vmem:[#allocation2 + $0x178] sm:$0xff]  ;;  %v1645_v21 = vld [vmem:[#allocation2 + $0x140] sm:$0xff]  ;;  %v1649_v22 = vld [vmem:[#allocation2 + $0x148] sm:$0xff] }
  0x14   :  { %134 = vmatpush.msra.mxu0 %v1621_v13  ;;  %174 = vmatpush.msra.mxu2 %v1627_v15  ;;  %v1651_v23 = vld [vmem:[#allocation2 + $0x150] sm:$0xff]  ;;  %v1655_v24 = vld [vmem:[#allocation2 + $0x158] sm:$0xff]  ;;  %v1657_v25 = vld [vmem:[#allocation2 + $0x120] sm:$0xff] }
  0x15   :  { %194 = vmatpush.msra.mxu3 %v1631_v16  ;;  %155 = vmatpush.msra.mxu1 %v1637_v18  ;;  %v1661_v26 = vld [vmem:[#allocation2 + $0x128] sm:$0xff]  ;;  %v1663_v27 = vld [vmem:[#allocation2 + $0x130] sm:$0xff]  ;;  %v1667_v28 = vld [vmem:[#allocation2 + $0x138] sm:$0xff] }
  0x16   :  { %135 = vmatpush.msra.mxu0 %v1633_v17  ;;  %175 = vmatpush.msra.mxu2 %v1639_v19  ;;  %v1669_v29 = vld [vmem:[#allocation2 + $0x100] sm:$0xff]  ;;  %v1673_v30 = vld [vmem:[#allocation2 + $0x108] sm:$0xff]  ;;  %v1675_v31 = vld [vmem:[#allocation2 + $0x110] sm:$0xff] }
  0x17   :  { %195 = vmatpush.msra.mxu3 %v1643_v20  ;;  %156 = vmatpush.msra.mxu1 %v1649_v22  ;;  %v1679_v32 = vld [vmem:[#allocation2 + $0x118] sm:$0xff]  ;;  %v1681_v33 = vld [vmem:[#allocation2 + $0xe0] sm:$0xff]  ;;  %v1685_v34 = vld [vmem:[#allocation2 + $0xe8] sm:$0xff] }
  0x18   :  { %136 = vmatpush.msra.mxu0 %v1645_v21  ;;  %176 = vmatpush.msra.mxu2 %v1651_v23  ;;  %v1687_v35 = vld [vmem:[#allocation2 + $0xf0] sm:$0xff]  ;;  %v1691_v36 = vld [vmem:[#allocation2 + $0xf8] sm:$0xff]  ;;  %v1693_v37 = vld [vmem:[#allocation2 + $0xc0] sm:$0xff] }
  0x19   :  { %196 = vmatpush.msra.mxu3 %v1655_v24  ;;  %157 = vmatpush.msra.mxu1 %v1661_v26  ;;  %2652 = vst [vmem:[#allocation12_spill] sm:$0xff] %v1691_v36  ;;  %v1697_v38 = vld [vmem:[#allocation2 + $0xc8] sm:$0xff]  ;;  %v1699_v39 = vld [vmem:[#allocation2 + $0xd0] sm:$0xff]  ;;  %v1703_v40 = vld [vmem:[#allocation2 + $0xd8] sm:$0xff] }
  0x1a   :  { %137 = vmatpush.msra.mxu0 %v1657_v25  ;;  %177 = vmatpush.msra.mxu2 %v1663_v27  ;;  %2653 = vst [vmem:[#allocation13_spill] sm:$0xff] %v1703_v40  ;;  %v1705_v41 = vld [vmem:[#allocation2 + $0xa0] sm:$0xff]  ;;  %v1709_v42 = vld [vmem:[#allocation2 + $0xa8] sm:$0xff]  ;;  %v1711_v43 = vld [vmem:[#allocation2 + $0xb0] sm:$0xff] }
  0x1b   :  { %197 = vmatpush.msra.mxu3 %v1667_v28  ;;  %158 = vmatpush.msra.mxu1 %v1673_v30  ;;  %2654 = vst [vmem:[#allocation14_spill] sm:$0xff] %v1705_v41  ;;  %v1715_v44 = vld [vmem:[#allocation2 + $0xb8] sm:$0xff]  ;;  %v1717_v45 = vld [vmem:[#allocation2 + $0x80] sm:$0xff]  ;;  %v1721_v46 = vld [vmem:[#allocation2 + $0x88] sm:$0xff] }
  0x1c   :  { %138 = vmatpush.msra.mxu0 %v1669_v29  ;;  %178 = vmatpush.msra.mxu2 %v1675_v31  ;;  %2655 = vst [vmem:[#allocation15_spill] sm:$0xff] %v1709_v42  ;;  %v1723_v47 = vld [vmem:[#allocation2 + $0x90] sm:$0xff]  ;;  %v1727_v48 = vld [vmem:[#allocation2 + $0x98] sm:$0xff]  ;;  %v1729_v49 = vld [vmem:[#allocation2 + $0x60] sm:$0xff] }
  0x1d   :  { %198 = vmatpush.msra.mxu3 %v1679_v32  ;;  %159 = vmatpush.msra.mxu1 %v1685_v34  ;;  %2656 = vst [vmem:[#allocation16_spill] sm:$0xff] %v1711_v43  ;;  %v1733_v50 = vld [vmem:[#allocation2 + $0x68] sm:$0xff]  ;;  %v1735_v51 = vld [vmem:[#allocation2 + $0x70] sm:$0xff]  ;;  %v1739_v52 = vld [vmem:[#allocation2 + $0x78] sm:$0xff] }
  0x1e   :  { %139 = vmatpush.msra.mxu0 %v1681_v33  ;;  %179 = vmatpush.msra.mxu2 %v1687_v35  ;;  %2657 = vst [vmem:[#allocation17_spill] sm:$0xff] %v1715_v44  ;;  %v1741_v53 = vld [vmem:[#allocation2 + $0x40] sm:$0xff]  ;;  %v1745_v54 = vld [vmem:[#allocation2 + $0x48] sm:$0xff]  ;;  %v1747_v55 = vld [vmem:[#allocation2 + $0x50] sm:$0xff] }
  0x1f   :  { %199 = vmatpush.msra.mxu3 %v1691_v36  ;;  %160 = vmatpush.msra.mxu1 %v1697_v38  ;;  %2658 = vst [vmem:[#allocation18_spill] sm:$0xff] %v1717_v45  ;;  %v1751_v56 = vld [vmem:[#allocation2 + $0x58] sm:$0xff]  ;;  %v1758_v57 = vld [vmem:[#allocation2 + $0x20] sm:$0xff]  ;;  %v1760_v58 = vld [vmem:[#allocation2 + $0x28] sm:$0xff] }
  0x20   :  { %140 = vmatpush.msra.mxu0 %v1693_v37  ;;  %180 = vmatpush.msra.mxu2 %v1699_v39  ;;  %2659 = vst [vmem:[#allocation19_spill] sm:$0xff] %v1721_v46  ;;  %v1762_v59 = vld [vmem:[#allocation2 + $0x30] sm:$0xff]  ;;  %v1766_v60 = vld [vmem:[#allocation2 + $0x38] sm:$0xff]  ;;  %v1770_v61 = vld [vmem:[#allocation2] sm:$0xff] }
  0x21   :  { %200 = vmatpush.msra.mxu3 %v1703_v40  ;;  %2660 = vst [vmem:[#allocation20_spill] sm:$0xff] %v1723_v47  ;;  %161 = vmatpush.msra.mxu1 %v1709_v42  ;;  %v1772_v62 = vld [vmem:[#allocation2 + $0x8] sm:$0xff]  ;;  %v1774_v63 = vld [vmem:[#allocation2 + $0x10] sm:$0xff]  ;;  %v1778_v0 = vld [vmem:[#allocation2 + $0x18] sm:$0xff] }
  0x22   :  { %141 = vmatpush.msra.mxu0 %v1705_v41  ;;  %181 = vmatpush.msra.mxu2 %v1711_v43  ;;  %2661 = vst [vmem:[#allocation21_spill] sm:$0xff] %v1727_v48 }
  0x23   :  { %2662 = vst [vmem:[#allocation22_spill] sm:$0xff] %v1729_v49  ;;  %201 = vmatpush.msra.mxu3 %v1715_v44  ;;  %162 = vmatpush.msra.mxu1 %v1721_v46 }
  0x24   :  { %142 = vmatpush.msra.mxu0 %v1717_v45  ;;  %2663 = vst [vmem:[#allocation23_spill] sm:$0xff] %v1733_v50  ;;  %182 = vmatpush.msra.mxu2 %v1723_v47 }
  0x25   :  { %2664 = vst [vmem:[#allocation24_spill] sm:$0xff] %v1735_v51  ;;  %202 = vmatpush.msra.mxu3 %v1727_v48  ;;  %163 = vmatpush.msra.mxu1 %v1733_v50 }
  0x26   :  { %2665 = vst [vmem:[#allocation25_spill] sm:$0xff] %v1739_v52  ;;  %143 = vmatpush.msra.mxu0 %v1729_v49  ;;  %183 = vmatpush.msra.mxu2 %v1735_v51 }
  0x27   :  { %2666 = vst [vmem:[#allocation26_spill] sm:$0xff] %v1741_v53  ;;  %203 = vmatpush.msra.mxu3 %v1739_v52  ;;  %164 = vmatpush.msra.mxu1 %v1745_v54 }
  0x28   :  { %2667 = vst [vmem:[#allocation27_spill] sm:$0xff] %v1745_v54  ;;  %144 = vmatpush.msra.mxu0 %v1741_v53  ;;  %184 = vmatpush.msra.mxu2 %v1747_v55 }
  0x29   :  { %2668 = vst [vmem:[#allocation28_spill] sm:$0xff] %v1747_v55  ;;  %204 = vmatpush.msra.mxu3 %v1751_v56  ;;  %165 = vmatpush.msra.mxu1 %v1760_v58 }
  0x2a   :  { %2669 = vst [vmem:[#allocation29_spill] sm:$0xff] %v1751_v56  ;;  %145 = vmatpush.msra.mxu0 %v1758_v57  ;;  %185 = vmatpush.msra.mxu2 %v1762_v59 }
  0x2b   :  { %2670 = vst [vmem:[#allocation30_spill] sm:$0xff] %v1758_v57  ;;  %205 = vmatpush.msra.mxu3 %v1766_v60  ;;  %166 = vmatpush.msra.mxu1 %v1772_v62 }
  0x2c   :  { %2671 = vst [vmem:[#allocation31_spill] sm:$0xff] %v1760_v58  ;;  %146 = vmatpush.msra.mxu0 %v1770_v61  ;;  %186 = vmatpush.msra.mxu2 %v1774_v63 }
  0x2d   :  { %2672 = vst [vmem:[#allocation32_spill] sm:$0xff] %v1762_v59  ;;  %206 = vmatpush.msra.mxu3 %v1778_v0  ;;  %286 = vmatpush.msrb.mxu1 %v1590_v2 }
  0x2e   :  { %2673 = vst [vmem:[#allocation33_spill] sm:$0xff] %v1766_v60  ;;  %266 = vmatpush.msrb.mxu0 %v1588_v1  ;;  %306 = vmatpush.msrb.mxu2 %v1595_v3 }
  0x2f   :  { %2674 = vst [vmem:[#allocation34_spill] sm:$0xff] %v1770_v61  ;;  %326 = vmatpush.msrb.mxu3 %v1597_v4  ;;  %287 = vmatpush.msrb.mxu1 %v1603_v6 }
  0x30   :  { %2675 = vst [vmem:[#allocation35_spill] sm:$0xff] %v1772_v62  ;;  %267 = vmatpush.msrb.mxu0 %v1599_v5  ;;  %307 = vmatpush.msrb.mxu2 %v1605_v7 }
  0x31   :  { %2676 = vst [vmem:[#allocation36_spill] sm:$0xff] %v1774_v63  ;;  %327 = vmatpush.msrb.mxu3 %v1607_v8  ;;  %288 = vmatpush.msrb.mxu1 %v1613_v10 }
  0x32   :  { %2677 = vst [vmem:[#allocation37_spill] sm:$0xff] %v1778_v0  ;;  %268 = vmatpush.msrb.mxu0 %v1611_v9  ;;  %308 = vmatpush.msrb.mxu2 %v1615_v11 }
  0x33   :  { %328 = vmatpush.msrb.mxu3 %v1619_v12  ;;  %289 = vmatpush.msrb.mxu1 %v1625_v14 }
  0x34   :  { %269 = vmatpush.msrb.mxu0 %v1621_v13  ;;  %309 = vmatpush.msrb.mxu2 %v1627_v15 }
  0x35   :  { %329 = vmatpush.msrb.mxu3 %v1631_v16  ;;  %290 = vmatpush.msrb.mxu1 %v1637_v18 }
  0x36   :  { %270 = vmatpush.msrb.mxu0 %v1633_v17  ;;  %310 = vmatpush.msrb.mxu2 %v1639_v19 }
  0x37   :  { %330 = vmatpush.msrb.mxu3 %v1643_v20  ;;  %291 = vmatpush.msrb.mxu1 %v1649_v22 }
  0x38   :  { %271 = vmatpush.msrb.mxu0 %v1645_v21  ;;  %311 = vmatpush.msrb.mxu2 %v1651_v23 }
  0x39   :  { %331 = vmatpush.msrb.mxu3 %v1655_v24  ;;  %292 = vmatpush.msrb.mxu1 %v1661_v26 }
  0x3a   :  { %272 = vmatpush.msrb.mxu0 %v1657_v25  ;;  %312 = vmatpush.msrb.mxu2 %v1663_v27 }
  0x3b   :  { %332 = vmatpush.msrb.mxu3 %v1667_v28  ;;  %293 = vmatpush.msrb.mxu1 %v1673_v30 }
  0x3c   :  { %273 = vmatpush.msrb.mxu0 %v1669_v29  ;;  %313 = vmatpush.msrb.mxu2 %v1675_v31 }
  0x3d   :  { %333 = vmatpush.msrb.mxu3 %v1679_v32  ;;  %294 = vmatpush.msrb.mxu1 %v1685_v34 }
  0x3e   :  { %274 = vmatpush.msrb.mxu0 %v1681_v33  ;;  %314 = vmatpush.msrb.mxu2 %v1687_v35 }
  0x3f   :  { %334 = vmatpush.msrb.mxu3 %v1691_v36  ;;  %295 = vmatpush.msrb.mxu1 %v1697_v38  ;;  %v126_v36 = vld [vmem:[%s2533_s0] sm:$0x1] }
  0x40   :  { %275 = vmatpush.msrb.mxu0 %v1693_v37  ;;  %315 = vmatpush.msrb.mxu2 %v1699_v39 }
  0x41   :  { %335 = vmatpush.msrb.mxu3 %v1703_v40  ;;  %296 = vmatpush.msrb.mxu1 %v1709_v42  ;;  %v127_v42 = vmax.f32 %v126_v36, 0.0  ;;  %v2678_v36 = vld [vmem:[#allocation12_spill] sm:$0xff] }
  0x42   :  { %276 = vmatpush.msrb.mxu0 %v1705_v41  ;;  %316 = vmatpush.msrb.mxu2 %v1711_v43 }
  0x43   :  { %336 = vmatpush.msrb.mxu3 %v1715_v44  ;;  %297 = vmatpush.msrb.mxu1 %v1721_v46 }
  0x44   :  { %277 = vmatpush.msrb.mxu0 %v1717_v45  ;;  %317 = vmatpush.msrb.mxu2 %v1723_v47 }
  0x45   :  { %337 = vmatpush.msrb.mxu3 %v1727_v48  ;;  %298 = vmatpush.msrb.mxu1 %v1733_v50 }
  0x46   :  { %278 = vmatpush.msrb.mxu0 %v1729_v49  ;;  %318 = vmatpush.msrb.mxu2 %v1735_v51 }
  0x47   :  { %338 = vmatpush.msrb.mxu3 %v1739_v52  ;;  %299 = vmatpush.msrb.mxu1 %v1745_v54 }
  0x48   :  { %279 = vmatpush.msrb.mxu0 %v1741_v53  ;;  %319 = vmatpush.msrb.mxu2 %v1747_v55 }
  0x49   :  { %339 = vmatpush.msrb.mxu3 %v1751_v56  ;;  %300 = vmatpush.msrb.mxu1 %v1760_v58 }
  0x4a   :  { %280 = vmatpush.msrb.mxu0 %v1758_v57  ;;  %320 = vmatpush.msrb.mxu2 %v1762_v59 }
  0x4b   :  { %340 = vmatpush.msrb.mxu3 %v1766_v60  ;;  %301 = vmatpush.msrb.mxu1 %v1772_v62 }
  0x4c   :  { %281 = vmatpush.msrb.mxu0 %v1770_v61  ;;  %321 = vmatpush.msrb.mxu2 %v1774_v63 }
  0x4d   :  { %341 = vmatpush.msrb.mxu3 %v1778_v0 }
  0x7f   :  { %v129_v47 = vpop.permute.xlu0 %128 }
  0x80   :  { %v130_v49 = vadd.f32 %v129_v47, %v127_v42  ;;  %v2679_v42 = vld [vmem:[#allocation15_spill] sm:$0xff]  ;;  %v2680_v47 = vld [vmem:[#allocation20_spill] sm:$0xff] }
  0x82   :  { %147 = vmatmul.f32.vlgmr.msra.gmra.mxu0 %v130_v49  ;;  %167 = vmatmul.f32.vlgmr.msra.gmra.mxu1 %v130_v49 }
  0x83   :  { %187 = vmatmul.f32.vlgmr.msra.gmra.mxu2 %v130_v49  ;;  %207 = vmatmul.f32.vlgmr.msra.gmra.mxu3 %v130_v49  ;;  %v2681_v49 = vld [vmem:[#allocation22_spill] sm:$0xff] }
  0x84   :  { %401 = vmatpush.msra.mxu0 %v1588_v1  ;;  %421 = vmatpush.msra.mxu1 %v1590_v2 }
  0x85   :  { %441 = vmatpush.msra.mxu2 %v1595_v3  ;;  %461 = vmatpush.msra.mxu3 %v1597_v4 }
  0x86   :  { %402 = vmatpush.msra.mxu0 %v1599_v5  ;;  %422 = vmatpush.msra.mxu1 %v1603_v6 }
  0x87   :  { %442 = vmatpush.msra.mxu2 %v1605_v7  ;;  %462 = vmatpush.msra.mxu3 %v1607_v8 }
  0x88   :  { %403 = vmatpush.msra.mxu0 %v1611_v9  ;;  %423 = vmatpush.msra.mxu1 %v1613_v10 }
  0x89   :  { %443 = vmatpush.msra.mxu2 %v1615_v11  ;;  %463 = vmatpush.msra.mxu3 %v1619_v12 }
  0x8a   :  { %404 = vmatpush.msra.mxu0 %v1621_v13  ;;  %424 = vmatpush.msra.mxu1 %v1625_v14 }
  0x8b   :  { %444 = vmatpush.msra.mxu2 %v1627_v15  ;;  %464 = vmatpush.msra.mxu3 %v1631_v16 }
  0x8c   :  { %405 = vmatpush.msra.mxu0 %v1633_v17  ;;  %425 = vmatpush.msra.mxu1 %v1637_v18 }
  0x8d   :  { %445 = vmatpush.msra.mxu2 %v1639_v19  ;;  %465 = vmatpush.msra.mxu3 %v1643_v20 }
  0x8e   :  { %406 = vmatpush.msra.mxu0 %v1645_v21  ;;  %426 = vmatpush.msra.mxu1 %v1649_v22 }
  0x8f   :  { %446 = vmatpush.msra.mxu2 %v1651_v23  ;;  %466 = vmatpush.msra.mxu3 %v1655_v24 }
  0x90   :  { %407 = vmatpush.msra.mxu0 %v1657_v25  ;;  %427 = vmatpush.msra.mxu1 %v1661_v26 }
  0x91   :  { %447 = vmatpush.msra.mxu2 %v1663_v27  ;;  %467 = vmatpush.msra.mxu3 %v1667_v28 }
  0x92   :  { %408 = vmatpush.msra.mxu0 %v1669_v29  ;;  %428 = vmatpush.msra.mxu1 %v1673_v30 }
  0x93   :  { %448 = vmatpush.msra.mxu2 %v1675_v31  ;;  %468 = vmatpush.msra.mxu3 %v1679_v32 }
  0x94   :  { %409 = vmatpush.msra.mxu0 %v1681_v33  ;;  %429 = vmatpush.msra.mxu1 %v1685_v34 }
  0x95   :  { %449 = vmatpush.msra.mxu2 %v1687_v35  ;;  %469 = vmatpush.msra.mxu3 %v2678_v36 }
  0x96   :  { %410 = vmatpush.msra.mxu0 %v1693_v37  ;;  %430 = vmatpush.msra.mxu1 %v1697_v38 }
  0x97   :  { %450 = vmatpush.msra.mxu2 %v1699_v39  ;;  %470 = vmatpush.msra.mxu3 %v1703_v40 }
  0x98   :  { %411 = vmatpush.msra.mxu0 %v1705_v41  ;;  %431 = vmatpush.msra.mxu1 %v2679_v42 }
  0x99   :  { %451 = vmatpush.msra.mxu2 %v1711_v43  ;;  %471 = vmatpush.msra.mxu3 %v1715_v44 }
  0x9a   :  { %412 = vmatpush.msra.mxu0 %v1717_v45  ;;  %432 = vmatpush.msra.mxu1 %v1721_v46 }
  0x9b   :  { %452 = vmatpush.msra.mxu2 %v2680_v47  ;;  %472 = vmatpush.msra.mxu3 %v1727_v48 }
  0x9c   :  { %413 = vmatpush.msra.mxu0 %v2681_v49  ;;  %433 = vmatpush.msra.mxu1 %v1733_v50 }
  0x9d   :  { %453 = vmatpush.msra.mxu2 %v1735_v51  ;;  %473 = vmatpush.msra.mxu3 %v1739_v52 }
  0x9e   :  { %414 = vmatpush.msra.mxu0 %v1741_v53  ;;  %434 = vmatpush.msra.mxu1 %v1745_v54 }
  0x9f   :  { %454 = vmatpush.msra.mxu2 %v1747_v55  ;;  %474 = vmatpush.msra.mxu3 %v1751_v56  ;;  %v1916_v56 = vld [vmem:[%s2536_s3] sm:$0x1]  ;;  %v1539_v55 = vmov 0.0  }
  0xa0   :  { %415 = vmatpush.msra.mxu0 %v1758_v57  ;;  %435 = vmatpush.msra.mxu1 %v1760_v58  ;;  %2682 = vst [vmem:[#allocation12_spill] sm:$0xff] %v1916_v56  ;;  %v1921_v58 = vld [vmem:[%s2536_s3 + $0x1] sm:$0x1] }
  0xa1   :  { %455 = vmatpush.msra.mxu2 %v1762_v59  ;;  %475 = vmatpush.msra.mxu3 %v1766_v60  ;;  %2683 = vst [vmem:[#allocation38_spill] sm:$0xff] %v1921_v58 }
  0xa2   :  { %416 = vmatpush.msra.mxu0 %v1770_v61  ;;  %436 = vmatpush.msra.mxu1 %v1772_v62  ;;  %124 = vst [vmem:[%s2539_s6] sm:$0xff] %v1539_v55  ;;  %v1931_v55 = vld [vmem:[%s2536_s3 + $0x3] sm:$0x1] }
  0xa3   :  { %456 = vmatpush.msra.mxu2 %v1774_v63  ;;  %476 = vmatpush.msra.mxu3 %v1778_v0 }
  0xff   :  { %v148_v59 = vpop.f32.mrf.mxu0  ;;  %v168_v60 = vpop.f32.mrf.mxu1 }
 0x100   :  { %v211_v61 = vadd.f32 %v148_v59, %v1916_v56  ;;  %v231_v62 = vadd.f32 %v168_v60, %v1921_v58 }
 0x102   :  { %v1278_v57 = vmul.f32 -1.442695, %v211_v61  ;;  %v1279_v63 = vmul.f32 -1.442695, %v231_v62 }
 0x104   :  { %1303 = vpow2.f32 %v1278_v57 }
 0x105   :  { %1305 = vpow2.f32 %v1279_v63  ;;  %v1936_v63 = vld [vmem:[%s2536_s3 + $0x2] sm:$0x1] }
 0x106   :  { %v208_v57 = vpop.f32.mrf.mxu3 }
 0x107   :  { %v252_v48 = vadd.f32 %v208_v57, %v1931_v55  ;;  %v2684_v57 = vld [vmem:[#allocation11_spill] sm:$0xff] }
 0x10a   :  { %v1304_v0 = vpop.eup %1303 }
 0x10b   :  { %v1306_v54 = vpop.eup %1305  ;;  %v215_v53 = vadd.f32 1.0, %v1304_v0 }
 0x10c   :  { %v235_v52 = vadd.f32 1.0, %v1306_v54 }
 0x10d   :  { %1307 = vrcp.f32 %v215_v53  ;;  %v227_v62 = vand.u32 2147483648, %v215_v53  ;;  %v225_v49 = vand.u32 2147483647, %v215_v53  ;;  %vm221_vm1 = vweird.f32 %v215_v53 }
 0x10e   :  { %1309 = vrcp.f32 %v235_v52  ;;  %vm241_vm5 = vweird.f32 %v235_v52 }
 0x10f   :  { %vm226_vm3 = vcmp.eq.f32.partialorder %v225_v49, 8.507059e+37 }
 0x113   :  { %v1308_v51 = vpop.eup %1307 }
 0x114   :  { %v1310_v50 = vpop.eup %1309  ;;  %v217_v59 = vmul.f32 %v1308_v51, %v215_v53  ;;  %vm222_vm0 = vweird.f32 %v1308_v51  ;;  %v245_v53 = vand.u32 2147483647, %v235_v52 }
 0x115   :  { %v237_v56 = vmul.f32 %v1310_v50, %v235_v52  ;;  %vm223_vm2 = vmor %vm221_vm1, %vm222_vm0  ;;  %vm242_vm4 = vweird.f32 %v1310_v50 }
 0x116   :  { %v218_v60 = vsub.f32 1.0, %v217_v59  ;;  %v188_v59 = vpop.f32.mrf.mxu2  ;;  %vm243_vm6 = vmor %vm241_vm5, %vm242_vm4  ;;  %vm246_vm7 = vcmp.eq.f32.partialorder %v245_v53, 8.507059e+37  ;;  %v2694_v53 = vld [vmem:[#allocation24_spill] sm:$0xff] }
 0x117   :  { %v238_v61 = vsub.f32 1.0, %v237_v56  ;;  %v228_v56 = vor.u32 1.1754944e-38, %v227_v62  ;;  %v251_v45 = vadd.f32 %v188_v59, %v1936_v63  ;;  %v2690_v59 = vld [vmem:[#allocation20_spill] sm:$0xff] }
 0x118   :  { %v219_v58 = vmul.f32 %v1308_v51, %v218_v60 }
 0x119   :  { %v239_v0 = vmul.f32 %v1310_v50, %v238_v61 }
 0x11a   :  { %v220_v54 = vadd.f32 %v1308_v51, %v219_v58  ;;  %v247_v58 = vand.u32 2147483648, %v235_v52  ;;  %v2687_v52 = vld [vmem:[#allocation17_spill] sm:$0xff] }
 0x11b   :  { %v240_v46 = vadd.f32 %v1310_v50, %v239_v0 }
 0x11c   :  { %v224_v60 = vsel %vm223_vm2, %v1308_v51, %v220_v54  ;;  %v248_v42 = vor.u32 1.1754944e-38, %v247_v58  ;;  %v2693_v58 = vld [vmem:[#allocation23_spill] sm:$0xff] }
 0x11d   :  { %v229_v47 = vsel %vm226_vm3, %v228_v56, %v224_v60  ;;  %v244_v43 = vsel %vm243_vm6, %v1310_v50, %v240_v46  ;;  %v2686_v50 = vld [vmem:[#allocation16_spill] sm:$0xff]  ;;  %v2691_v60 = vld [vmem:[#allocation21_spill] sm:$0xff] }
 0x11e   :  { %v253_v61 = vmul.f32 %v252_v48, %v229_v47  ;;  %v249_v62 = vsel %vm246_vm7, %v248_v42, %v244_v43  ;;  %v2685_v48 = vld [vmem:[#allocation15_spill] sm:$0xff]  ;;  %v2688_v42 = vld [vmem:[#allocation18_spill] sm:$0xff] }
 0x11f   :  { %v256_v51 = vsub.f32 1.0, %v249_v62  ;;  %v258_v56 = vmul.f32 %v249_v62, %v2684_v57  ;;  %v2689_v47 = vld [vmem:[#allocation19_spill] sm:$0xff]  ;;  %v2695_v62 = vld [vmem:[#allocation25_spill] sm:$0xff] }
 0x120   :  { %v254_v44 = vadd.f32 %v253_v61, %v251_v45  ;;  %v2692_v61 = vld [vmem:[#allocation22_spill] sm:$0xff]  ;;  %v2699_v57 = vld [vmem:[#allocation29_spill] sm:$0xff] }
 0x122   :  { %1311 = vtanh.f32 %v254_v44  ;;  %v261_v44 = vld [vmem:[%s2533_s0 + $0x1] sm:$0x1] }
 0x123   :  { %v262_v43 = vmax.f32 %v261_v44, 0.0  ;;  %v2701_v44 = vld [vmem:[#allocation31_spill] sm:$0xff] }
 0x128   :  { %v1312_v49 = vpop.eup %1311 }
 0x129   :  { %v257_v54 = vmul.f32 %v1312_v49, %v256_v51  ;;  %v2696_v51 = vld [vmem:[#allocation26_spill] sm:$0xff]  ;;  %v2697_v49 = vld [vmem:[#allocation27_spill] sm:$0xff] }
 0x12b   :  { %v1941_v0 = vadd.f32 %v258_v56, %v257_v54  ;;  %v2698_v54 = vld [vmem:[#allocation28_spill] sm:$0xff]  ;;  %v2700_v56 = vld [vmem:[#allocation30_spill] sm:$0xff] }
 0x12d   :  { %263 = vrot.lane.b32.xlu0 %v1941_v0, %s1535_s30  ;;  %260 = vst [vmem:[%s2539_s6] sm:$0x1] %v1941_v0 }
 0x19f   :  { %v264_v45 = vpop.permute.xlu0 %263 }
 0x1a0   :  { %v265_v46 = vadd.f32 %v264_v45, %v262_v43  ;;  %v2702_v43 = vld [vmem:[#allocation32_spill] sm:$0xff]  ;;  %v2703_v45 = vld [vmem:[#allocation33_spill] sm:$0xff] }
 0x1a2   :  { %282 = vmatmul.f32.vlgmr.msrb.gmra.mxu0 %v265_v46  ;;  %302 = vmatmul.f32.vlgmr.msrb.gmra.mxu1 %v265_v46 }
 0x1a3   :  { %322 = vmatmul.f32.vlgmr.msrb.gmra.mxu2 %v265_v46  ;;  %342 = vmatmul.f32.vlgmr.msrb.gmra.mxu3 %v265_v46  ;;  %v2704_v46 = vld [vmem:[#allocation34_spill] sm:$0xff] }
 0x1a4   :  { %536 = vmatpush.msrb.mxu0 %v1588_v1  ;;  %556 = vmatpush.msrb.mxu1 %v1590_v2 }
 0x1a5   :  { %576 = vmatpush.msrb.mxu2 %v1595_v3  ;;  %596 = vmatpush.msrb.mxu3 %v1597_v4 }
 0x1a6   :  { %537 = vmatpush.msrb.mxu0 %v1599_v5  ;;  %557 = vmatpush.msrb.mxu1 %v1603_v6 }
 0x1a7   :  { %577 = vmatpush.msrb.mxu2 %v1605_v7  ;;  %597 = vmatpush.msrb.mxu3 %v1607_v8 }
 0x1a8   :  { %538 = vmatpush.msrb.mxu0 %v1611_v9  ;;  %558 = vmatpush.msrb.mxu1 %v1613_v10 }
 0x1a9   :  { %578 = vmatpush.msrb.mxu2 %v1615_v11  ;;  %598 = vmatpush.msrb.mxu3 %v1619_v12 }
 0x1aa   :  { %539 = vmatpush.msrb.mxu0 %v1621_v13  ;;  %559 = vmatpush.msrb.mxu1 %v1625_v14 }
 0x1ab   :  { %579 = vmatpush.msrb.mxu2 %v1627_v15  ;;  %599 = vmatpush.msrb.mxu3 %v1631_v16 }
 0x1ac   :  { %540 = vmatpush.msrb.mxu0 %v1633_v17  ;;  %560 = vmatpush.msrb.mxu1 %v1637_v18 }
 0x1ad   :  { %580 = vmatpush.msrb.mxu2 %v1639_v19  ;;  %600 = vmatpush.msrb.mxu3 %v1643_v20 }
 0x1ae   :  { %541 = vmatpush.msrb.mxu0 %v1645_v21  ;;  %561 = vmatpush.msrb.mxu1 %v1649_v22 }
 0x1af   :  { %581 = vmatpush.msrb.mxu2 %v1651_v23  ;;  %601 = vmatpush.msrb.mxu3 %v1655_v24 }
 0x1b0   :  { %542 = vmatpush.msrb.mxu0 %v1657_v25  ;;  %562 = vmatpush.msrb.mxu1 %v1661_v26 }
 0x1b1   :  { %582 = vmatpush.msrb.mxu2 %v1663_v27  ;;  %602 = vmatpush.msrb.mxu3 %v1667_v28 }
 0x1b2   :  { %543 = vmatpush.msrb.mxu0 %v1669_v29  ;;  %563 = vmatpush.msrb.mxu1 %v1673_v30 }
 0x1b3   :  { %583 = vmatpush.msrb.mxu2 %v1675_v31  ;;  %603 = vmatpush.msrb.mxu3 %v1679_v32 }
 0x1b4   :  { %544 = vmatpush.msrb.mxu0 %v1681_v33  ;;  %564 = vmatpush.msrb.mxu1 %v1685_v34 }
 0x1b5   :  { %584 = vmatpush.msrb.mxu2 %v1687_v35  ;;  %604 = vmatpush.msrb.mxu3 %v2678_v36 }
 0x1b6   :  { %545 = vmatpush.msrb.mxu0 %v1693_v37  ;;  %565 = vmatpush.msrb.mxu1 %v1697_v38 }
 0x1b7   :  { %585 = vmatpush.msrb.mxu2 %v1699_v39  ;;  %605 = vmatpush.msrb.mxu3 %v1703_v40 }
 0x1b8   :  { %546 = vmatpush.msrb.mxu0 %v1705_v41  ;;  %566 = vmatpush.msrb.mxu1 %v2685_v48 }
 0x1b9   :  { %586 = vmatpush.msrb.mxu2 %v2686_v50  ;;  %606 = vmatpush.msrb.mxu3 %v2687_v52 }
 0x1ba   :  { %547 = vmatpush.msrb.mxu0 %v2688_v42  ;;  %567 = vmatpush.msrb.mxu1 %v2689_v47 }
 0x1bb   :  { %587 = vmatpush.msrb.mxu2 %v2690_v59  ;;  %607 = vmatpush.msrb.mxu3 %v2691_v60 }
 0x1bc   :  { %548 = vmatpush.msrb.mxu0 %v2692_v61  ;;  %568 = vmatpush.msrb.mxu1 %v2693_v58  ;;  %v2708_v58 = vld [vmem:[#allocation12_spill] sm:$0xff]  ;;  %v2709_v61 = vld [vmem:[#allocation38_spill] sm:$0xff] }
 0x1bd   :  { %588 = vmatpush.msrb.mxu2 %v2694_v53  ;;  %608 = vmatpush.msrb.mxu3 %v2695_v62  ;;  %v2705_v53 = vld [vmem:[#allocation35_spill] sm:$0xff]  ;;  %v2706_v62 = vld [vmem:[#allocation36_spill] sm:$0xff] }
 0x1be   :  { %549 = vmatpush.msrb.mxu0 %v2696_v51  ;;  %569 = vmatpush.msrb.mxu1 %v2697_v49  ;;  %v2707_v51 = vld [vmem:[#allocation37_spill] sm:$0xff] }
 0x1bf   :  { %589 = vmatpush.msrb.mxu2 %v2698_v54  ;;  %609 = vmatpush.msrb.mxu3 %v2699_v57 }
 0x1c0   :  { %550 = vmatpush.msrb.mxu0 %v2700_v56  ;;  %570 = vmatpush.msrb.mxu1 %v2701_v44 }
 0x1c1   :  { %590 = vmatpush.msrb.mxu2 %v2702_v43  ;;  %610 = vmatpush.msrb.mxu3 %v2703_v45 }
 0x1c2   :  { %551 = vmatpush.msrb.mxu0 %v2704_v46  ;;  %571 = vmatpush.msrb.mxu1 %v2705_v53 }
 0x1c3   :  { %591 = vmatpush.msrb.mxu2 %v2706_v62  ;;  %611 = vmatpush.msrb.mxu3 %v2707_v51 }
 0x21f   :  { %v283_v49 = vpop.f32.mrf.mxu0  ;;  %v303_v54 = vpop.f32.mrf.mxu1 }
 0x220   :  { %v346_v57 = vadd.f32 %v283_v49, %v2708_v58  ;;  %v366_v56 = vadd.f32 %v303_v54, %v2709_v61 }
 0x222   :  { %v1280_v60 = vmul.f32 -1.442695, %v346_v57  ;;  %v1281_v44 = vmul.f32 -1.442695, %v366_v56 }
 0x224   :  { %1313 = vpow2.f32 %v1280_v60 }
 0x225   :  { %1315 = vpow2.f32 %v1281_v44 }
 0x226   :  { %v343_v57 = vpop.f32.mrf.mxu3  ;;  %v323_v44 = vpop.f32.mrf.mxu2 }
 0x227   :  { %v387_v61 = vadd.f32 %v343_v57, %v1931_v55 }
 0x22a   :  { %v1314_v43 = vpop.eup %1313 }
 0x22b   :  { %v1316_v45 = vpop.eup %1315  ;;  %v350_v59 = vadd.f32 1.0, %v1314_v43 }
 0x22c   :  { %v370_v46 = vadd.f32 1.0, %v1316_v45 }
 0x22d   :  { %1317 = vrcp.f32 %v350_v59  ;;  %v362_v50 = vand.u32 2147483648, %v350_v59  ;;  %v360_v54 = vand.u32 2147483647, %v350_v59  ;;  %vm356_vm9 = vweird.f32 %v350_v59 }
 0x22e   :  { %1319 = vrcp.f32 %v370_v46  ;;  %vm376_vm13 = vweird.f32 %v370_v46  ;;  %v380_v41 = vand.u32 2147483647, %v370_v46 }
 0x22f   :  { %v363_v43 = vor.u32 1.1754944e-38, %v362_v50  ;;  %vm361_vm11 = vcmp.eq.f32.partialorder %v360_v54, 8.507059e+37 }
 0x230   :  { %vm381_vm15 = vcmp.eq.f32.partialorder %v380_v41, 8.507059e+37 }
 0x233   :  { %v1318_v53 = vpop.eup %1317 }
 0x234   :  { %v1320_v62 = vpop.eup %1319  ;;  %v352_v47 = vmul.f32 %v1318_v53, %v350_v59  ;;  %vm357_vm8 = vweird.f32 %v1318_v53 }
 0x235   :  { %v372_v51 = vmul.f32 %v1320_v62, %v370_v46  ;;  %vm358_vm10 = vmor %vm356_vm9, %vm357_vm8  ;;  %vm377_vm12 = vweird.f32 %v1320_v62 }
 0x236   :  { %v353_v42 = vsub.f32 1.0, %v352_v47  ;;  %v386_v47 = vadd.f32 %v323_v44, %v1936_v63  ;;  %vm378_vm14 = vmor %vm376_vm13, %vm377_vm12 }
 0x237   :  { %v373_v52 = vsub.f32 1.0, %v372_v51 }
 0x238   :  { %v354_v49 = vmul.f32 %v1318_v53, %v353_v42  ;;  %v382_v42 = vand.u32 2147483648, %v370_v46 }
 0x239   :  { %v374_v56 = vmul.f32 %v1320_v62, %v373_v52 }
 0x23a   :  { %v355_v60 = vadd.f32 %v1318_v53, %v354_v49  ;;  %v383_v59 = vor.u32 1.1754944e-38, %v382_v42 }
 0x23b   :  { %v375_v48 = vadd.f32 %v1320_v62, %v374_v56 }
 0x23c   :  { %v359_v45 = vsel %vm358_vm10, %v1318_v53, %v355_v60 }
 0x23d   :  { %v364_v58 = vsel %vm361_vm11, %v363_v43, %v359_v45  ;;  %v379_v52 = vsel %vm378_vm14, %v1320_v62, %v375_v48 }
 0x23e   :  { %v388_v51 = vmul.f32 %v387_v61, %v364_v58  ;;  %v384_v50 = vsel %vm381_vm15, %v383_v59, %v379_v52 }
 0x23f   :  { %v391_v53 = vsub.f32 1.0, %v384_v50  ;;  %v393_v57 = vmul.f32 %v384_v50, %v1941_v0 }
 0x240   :  { %v389_v40 = vadd.f32 %v388_v51, %v386_v47 }
 0x242   :  { %1321 = vtanh.f32 %v389_v40  ;;  %v396_v40 = vld [vmem:[%s2533_s0 + $0x2] sm:$0x1] }
 0x243   :  { %v397_v41 = vmax.f32 %v396_v40, 0.0 }
 0x248   :  { %v1322_v49 = vpop.eup %1321 }
 0x249   :  { %v392_v54 = vmul.f32 %v1322_v49, %v391_v53 }
 0x24b   :  { %v2021_v56 = vadd.f32 %v393_v57, %v392_v54 }
 0x24d   :  { %398 = vrot.lane.b32.xlu1 %v2021_v56, %s1535_s30  ;;  %395 = vst [vmem:[%s2539_s6 + $0x1] sm:$0x1] %v2021_v56 }
 0x2bf   :  { %v399_v48 = vpop.permute.xlu1 %398 }
 0x2c0   :  { %v400_v61 = vadd.f32 %v399_v48, %v397_v41 }
 0x2c2   :  { %417 = vmatmul.f32.vlgmr.msra.gmra.mxu0 %v400_v61  ;;  %437 = vmatmul.f32.vlgmr.msra.gmra.mxu1 %v400_v61 }
 0x2c3   :  { %457 = vmatmul.f32.vlgmr.msra.gmra.mxu2 %v400_v61  ;;  %477 = vmatmul.f32.vlgmr.msra.gmra.mxu3 %v400_v61 }
 0x2c4   :  { %671 = vmatpush.msra.mxu0 %v1588_v1  ;;  %691 = vmatpush.msra.mxu1 %v1590_v2  ;;  %v2710_v1 = vld [vmem:[#allocation13_spill] sm:$0xff]  ;;  %v2711_v2 = vld [vmem:[#allocation14_spill] sm:$0xff] }
 0x2c5   :  { %711 = vmatpush.msra.mxu2 %v1595_v3  ;;  %731 = vmatpush.msra.mxu3 %v1597_v4  ;;  %v2712_v3 = vld [vmem:[#allocation15_spill] sm:$0xff]  ;;  %v2713_v4 = vld [vmem:[#allocation16_spill] sm:$0xff] }
 0x2c6   :  { %672 = vmatpush.msra.mxu0 %v1599_v5  ;;  %692 = vmatpush.msra.mxu1 %v1603_v6  ;;  %v2714_v5 = vld [vmem:[#allocation17_spill] sm:$0xff]  ;;  %v2715_v6 = vld [vmem:[#allocation18_spill] sm:$0xff] }
 0x2c7   :  { %712 = vmatpush.msra.mxu2 %v1605_v7  ;;  %732 = vmatpush.msra.mxu3 %v1607_v8  ;;  %v2716_v7 = vld [vmem:[#allocation19_spill] sm:$0xff]  ;;  %v2717_v8 = vld [vmem:[#allocation20_spill] sm:$0xff] }
 0x2c8   :  { %673 = vmatpush.msra.mxu0 %v1611_v9  ;;  %693 = vmatpush.msra.mxu1 %v1613_v10  ;;  %v2718_v9 = vld [vmem:[#allocation21_spill] sm:$0xff]  ;;  %v2719_v10 = vld [vmem:[#allocation22_spill] sm:$0xff] }
 0x2c9   :  { %713 = vmatpush.msra.mxu2 %v1615_v11  ;;  %733 = vmatpush.msra.mxu3 %v1619_v12  ;;  %v2720_v11 = vld [vmem:[#allocation23_spill] sm:$0xff]  ;;  %v2721_v12 = vld [vmem:[#allocation24_spill] sm:$0xff] }
 0x2ca   :  { %674 = vmatpush.msra.mxu0 %v1621_v13  ;;  %694 = vmatpush.msra.mxu1 %v1625_v14  ;;  %v2722_v13 = vld [vmem:[#allocation25_spill] sm:$0xff]  ;;  %v2723_v14 = vld [vmem:[#allocation26_spill] sm:$0xff] }
 0x2cb   :  { %714 = vmatpush.msra.mxu2 %v1627_v15  ;;  %734 = vmatpush.msra.mxu3 %v1631_v16  ;;  %v2724_v15 = vld [vmem:[#allocation27_spill] sm:$0xff]  ;;  %v2725_v16 = vld [vmem:[#allocation28_spill] sm:$0xff] }
 0x2cc   :  { %675 = vmatpush.msra.mxu0 %v1633_v17  ;;  %695 = vmatpush.msra.mxu1 %v1637_v18  ;;  %v2726_v17 = vld [vmem:[#allocation29_spill] sm:$0xff]  ;;  %v2727_v18 = vld [vmem:[#allocation30_spill] sm:$0xff] }
 0x2cd   :  { %715 = vmatpush.msra.mxu2 %v1639_v19  ;;  %735 = vmatpush.msra.mxu3 %v1643_v20  ;;  %v2728_v19 = vld [vmem:[#allocation31_spill] sm:$0xff]  ;;  %v2729_v20 = vld [vmem:[#allocation32_spill] sm:$0xff] }
 0x2ce   :  { %676 = vmatpush.msra.mxu0 %v1645_v21  ;;  %696 = vmatpush.msra.mxu1 %v1649_v22  ;;  %v2730_v21 = vld [vmem:[#allocation33_spill] sm:$0xff]  ;;  %v2731_v22 = vld [vmem:[#allocation34_spill] sm:$0xff] }
 0x2cf   :  { %716 = vmatpush.msra.mxu2 %v1651_v23  ;;  %736 = vmatpush.msra.mxu3 %v1655_v24  ;;  %v2732_v23 = vld [vmem:[#allocation35_spill] sm:$0xff]  ;;  %v2733_v24 = vld [vmem:[#allocation36_spill] sm:$0xff] }
 0x2d0   :  { %677 = vmatpush.msra.mxu0 %v1657_v25  ;;  %697 = vmatpush.msra.mxu1 %v1661_v26  ;;  %v2734_v25 = vld [vmem:[#allocation37_spill] sm:$0xff] }
 0x2d1   :  { %717 = vmatpush.msra.mxu2 %v1663_v27  ;;  %737 = vmatpush.msra.mxu3 %v1667_v28  ;;  %v2735_v28 = vld [vmem:[#allocation12_spill] sm:$0xff] }
 0x2d2   :  { %678 = vmatpush.msra.mxu0 %v1669_v29  ;;  %698 = vmatpush.msra.mxu1 %v1673_v30  ;;  %v2736_v30 = vld [vmem:[#allocation38_spill] sm:$0xff] }
 0x2d3   :  { %718 = vmatpush.msra.mxu2 %v1675_v31  ;;  %738 = vmatpush.msra.mxu3 %v1679_v32 }
 0x2d4   :  { %679 = vmatpush.msra.mxu0 %v1681_v33  ;;  %699 = vmatpush.msra.mxu1 %v1685_v34 }
 0x2d5   :  { %719 = vmatpush.msra.mxu2 %v1687_v35  ;;  %739 = vmatpush.msra.mxu3 %v2678_v36 }
 0x2d6   :  { %680 = vmatpush.msra.mxu0 %v1693_v37  ;;  %700 = vmatpush.msra.mxu1 %v1697_v38 }
 0x2d7   :  { %720 = vmatpush.msra.mxu2 %v1699_v39  ;;  %740 = vmatpush.msra.mxu3 %v2710_v1 }
 0x2d8   :  { %681 = vmatpush.msra.mxu0 %v2711_v2  ;;  %701 = vmatpush.msra.mxu1 %v2712_v3 }
 0x2d9   :  { %721 = vmatpush.msra.mxu2 %v2713_v4  ;;  %741 = vmatpush.msra.mxu3 %v2714_v5 }
 0x2da   :  { %682 = vmatpush.msra.mxu0 %v2715_v6  ;;  %702 = vmatpush.msra.mxu1 %v2716_v7 }
 0x2db   :  { %722 = vmatpush.msra.mxu2 %v2717_v8  ;;  %742 = vmatpush.msra.mxu3 %v2718_v9  ;;  %v531_v8 = vld [vmem:[%s2533_s0 + $0x3] sm:$0x1] }
 0x2dc   :  { %683 = vmatpush.msra.mxu0 %v2719_v10  ;;  %703 = vmatpush.msra.mxu1 %v2720_v11  ;;  %v532_v9 = vmax.f32 %v531_v8, 0.0  ;;  %v2277_v8 = vld [vmem:[#allocation2 + $0x58] sm:$0xff] }
 0x2dd   :  { %723 = vmatpush.msra.mxu2 %v2721_v12  ;;  %743 = vmatpush.msra.mxu3 %v2722_v13  ;;  %v2115_v12 = vld [vmem:[#allocation2 + $0x1e8] sm:$0xff]  ;;  %v2118_v13 = vld [vmem:[#allocation2 + $0x1f0] sm:$0xff]  ;;  %2753 = vst [vmem:[#allocation28_spill] sm:$0xff] %v2277_v8 }
 0x2de   :  { %684 = vmatpush.msra.mxu0 %v2723_v14  ;;  %704 = vmatpush.msra.mxu1 %v2724_v15  ;;  %v2121_v14 = vld [vmem:[#allocation2 + $0x1f8] sm:$0xff]  ;;  %v2124_v15 = vld [vmem:[#allocation2 + $0x1c0] sm:$0xff] }
 0x2df   :  { %724 = vmatpush.msra.mxu2 %v2725_v16  ;;  %744 = vmatpush.msra.mxu3 %v2726_v17  ;;  %v2127_v16 = vld [vmem:[#allocation2 + $0x1c8] sm:$0xff]  ;;  %v2130_v17 = vld [vmem:[#allocation2 + $0x1d0] sm:$0xff] }
 0x2e0   :  { %685 = vmatpush.msra.mxu0 %v2727_v18  ;;  %705 = vmatpush.msra.mxu1 %v2728_v19  ;;  %v2133_v18 = vld [vmem:[#allocation2 + $0x1d8] sm:$0xff]  ;;  %v2136_v19 = vld [vmem:[#allocation2 + $0x1a0] sm:$0xff] }
 0x2e1   :  { %725 = vmatpush.msra.mxu2 %v2729_v20  ;;  %745 = vmatpush.msra.mxu3 %v2730_v21  ;;  %v2139_v20 = vld [vmem:[#allocation2 + $0x1a8] sm:$0xff]  ;;  %v2142_v21 = vld [vmem:[#allocation2 + $0x1b0] sm:$0xff] }
 0x2e2   :  { %686 = vmatpush.msra.mxu0 %v2731_v22  ;;  %706 = vmatpush.msra.mxu1 %v2732_v23  ;;  %v2145_v22 = vld [vmem:[#allocation2 + $0x1b8] sm:$0xff]  ;;  %v2148_v23 = vld [vmem:[#allocation2 + $0x180] sm:$0xff] }
 0x2e3   :  { %726 = vmatpush.msra.mxu2 %v2733_v24  ;;  %746 = vmatpush.msra.mxu3 %v2734_v25  ;;  %v2151_v24 = vld [vmem:[#allocation2 + $0x188] sm:$0xff]  ;;  %v2154_v25 = vld [vmem:[#allocation2 + $0x190] sm:$0xff] }
 0x33f   :  { %v418_v26 = vpop.f32.mrf.mxu0  ;;  %v438_v27 = vpop.f32.mrf.mxu1 }
 0x340   :  { %v481_v29 = vadd.f32 %v418_v26, %v2735_v28  ;;  %v501_v31 = vadd.f32 %v438_v27, %v2736_v30  ;;  %v2157_v26 = vld [vmem:[#allocation2 + $0x198] sm:$0xff]  ;;  %v2160_v27 = vld [vmem:[#allocation2 + $0x160] sm:$0xff] }
 0x342   :  { %v1282_v32 = vmul.f32 -1.442695, %v481_v29  ;;  %v1283_v33 = vmul.f32 -1.442695, %v501_v31  ;;  %v2163_v29 = vld [vmem:[#allocation2 + $0x168] sm:$0xff]  ;;  %v2166_v31 = vld [vmem:[#allocation2 + $0x170] sm:$0xff] }
 0x344   :  { %1323 = vpow2.f32 %v1282_v32  ;;  %v2169_v32 = vld [vmem:[#allocation2 + $0x178] sm:$0xff] }
 0x345   :  { %1325 = vpow2.f32 %v1283_v33  ;;  %v2172_v33 = vld [vmem:[#allocation2 + $0x140] sm:$0xff] }
 0x346   :  { %v478_v45 = vpop.f32.mrf.mxu3  ;;  %v458_v42 = vpop.f32.mrf.mxu2 }
 0x347   :  { %v522_v50 = vadd.f32 %v478_v45, %v1931_v55  ;;  %v521_v54 = vadd.f32 %v458_v42, %v1936_v63  ;;  %v2214_v45 = vld [vmem:[#allocation2 + $0xf0] sm:$0xff]  ;;  %v2223_v42 = vld [vmem:[#allocation2 + $0xc8] sm:$0xff] }
 0x34a   :  { %v1324_v34 = vpop.eup %1323 }
 0x34b   :  { %v1326_v35 = vpop.eup %1325  ;;  %v485_v37 = vadd.f32 1.0, %v1324_v34  ;;  %v2175_v34 = vld [vmem:[#allocation2 + $0x148] sm:$0xff] }
 0x34c   :  { %v505_v38 = vadd.f32 1.0, %v1326_v35  ;;  %v2178_v35 = vld [vmem:[#allocation2 + $0x150] sm:$0xff] }
 0x34d   :  { %1327 = vrcp.f32 %v485_v37  ;;  %v497_v60 = vand.u32 2147483648, %v485_v37  ;;  %v495_v43 = vand.u32 2147483647, %v485_v37  ;;  %vm491_vm1 = vweird.f32 %v485_v37 }
 0x34e   :  { %1329 = vrcp.f32 %v505_v38  ;;  %v517_v40 = vand.u32 2147483648, %v505_v38  ;;  %vm511_vm5 = vweird.f32 %v505_v38  ;;  %v515_v41 = vand.u32 2147483647, %v505_v38 }
 0x34f   :  { %v498_v52 = vor.u32 1.1754944e-38, %v497_v60  ;;  %vm496_vm3 = vcmp.eq.f32.partialorder %v495_v43, 8.507059e+37  ;;  %v2205_v60 = vld [vmem:[#allocation2 + $0x118] sm:$0xff]  ;;  %v2211_v43 = vld [vmem:[#allocation2 + $0xe8] sm:$0xff] }
 0x350   :  { %v518_v1 = vor.u32 1.1754944e-38, %v517_v40  ;;  %vm516_vm7 = vcmp.eq.f32.partialorder %v515_v41, 8.507059e+37  ;;  %v2247_v40 = vld [vmem:[#allocation2 + $0x88] sm:$0xff]  ;;  %v2250_v41 = vld [vmem:[#allocation2 + $0x90] sm:$0xff] }
 0x351   :  { %2743 = vst [vmem:[#allocation18_spill] sm:$0xff] %v2247_v40 }
 0x352   :  { %2744 = vst [vmem:[#allocation19_spill] sm:$0xff] %v2250_v41 }
 0x353   :  { %v1328_v39 = vpop.eup %1327 }
 0x354   :  { %v1330_v36 = vpop.eup %1329  ;;  %v487_v0 = vmul.f32 %v1328_v39, %v485_v37  ;;  %vm492_vm0 = vweird.f32 %v1328_v39  ;;  %v2181_v37 = vld [vmem:[#allocation2 + $0x158] sm:$0xff] }
 0x355   :  { %v507_v58 = vmul.f32 %v1330_v36, %v505_v38  ;;  %vm493_vm2 = vmor %vm491_vm1, %vm492_vm0  ;;  %vm512_vm4 = vweird.f32 %v1330_v36  ;;  %v2184_v38 = vld [vmem:[#allocation2 + $0x120] sm:$0xff] }
 0x356   :  { %v488_v62 = vsub.f32 1.0, %v487_v0  ;;  %vm513_vm6 = vmor %vm511_vm5, %vm512_vm4  ;;  %v2193_v0 = vld [vmem:[#allocation2 + $0x138] sm:$0xff] }
 0x357   :  { %v508_v46 = vsub.f32 1.0, %v507_v58  ;;  %v2196_v58 = vld [vmem:[#allocation2 + $0x100] sm:$0xff] }
 0x358   :  { %v489_v44 = vmul.f32 %v1328_v39, %v488_v62  ;;  %v2199_v62 = vld [vmem:[#allocation2 + $0x108] sm:$0xff] }
 0x359   :  { %v509_v47 = vmul.f32 %v1330_v36, %v508_v46  ;;  %v2202_v46 = vld [vmem:[#allocation2 + $0x110] sm:$0xff] }
 0x35a   :  { %v490_v51 = vadd.f32 %v1328_v39, %v489_v44  ;;  %v2208_v44 = vld [vmem:[#allocation2 + $0xe0] sm:$0xff] }
 0x35b   :  { %v510_v49 = vadd.f32 %v1330_v36, %v509_v47  ;;  %v2217_v47 = vld [vmem:[#allocation2 + $0xf8] sm:$0xff] }
 0x35c   :  { %v494_v59 = vsel %vm493_vm2, %v1328_v39, %v490_v51  ;;  %v2187_v39 = vld [vmem:[#allocation2 + $0x128] sm:$0xff]  ;;  %v2220_v51 = vld [vmem:[#allocation2 + $0xc0] sm:$0xff] }
 0x35d   :  { %v499_v53 = vsel %vm496_vm3, %v498_v52, %v494_v59  ;;  %v514_v61 = vsel %vm513_vm6, %v1330_v36, %v510_v49  ;;  %v2190_v36 = vld [vmem:[#allocation2 + $0x130] sm:$0xff]  ;;  %v2229_v59 = vld [vmem:[#allocation2 + $0xd8] sm:$0xff] }
 0x35e   :  { %v523_v57 = vmul.f32 %v522_v50, %v499_v53  ;;  %v519_v2 = vsel %vm516_vm7, %v518_v1, %v514_v61  ;;  %v2226_v52 = vld [vmem:[#allocation2 + $0xd0] sm:$0xff]  ;;  %2737 = vst [vmem:[#allocation11_spill] sm:$0xff] %v2229_v59  ;;  %v2232_v50 = vld [vmem:[#allocation2 + $0xa0] sm:$0xff]  ;;  %v2235_v53 = vld [vmem:[#allocation2 + $0xa8] sm:$0xff] }
 0x35f   :  { %v526_v3 = vsub.f32 1.0, %v519_v2  ;;  %v528_v6 = vmul.f32 %v519_v2, %v2021_v56  ;;  %v2112_v56 = vld [vmem:[#allocation2 + $0x1e0] sm:$0xff]  ;;  %2738 = vst [vmem:[#allocation13_spill] sm:$0xff] %v2232_v50  ;;  %v2238_v49 = vld [vmem:[#allocation2 + $0xb0] sm:$0xff]  ;;  %v2259_v1 = vld [vmem:[#allocation2 + $0x68] sm:$0xff] }
 0x360   :  { %v524_v48 = vadd.f32 %v523_v57, %v521_v54  ;;  %2739 = vst [vmem:[#allocation14_spill] sm:$0xff] %v2235_v53  ;;  %v2241_v54 = vld [vmem:[#allocation2 + $0xb8] sm:$0xff]  ;;  %v2244_v57 = vld [vmem:[#allocation2 + $0x80] sm:$0xff]  ;;  %v2262_v2 = vld [vmem:[#allocation2 + $0x70] sm:$0xff] }
 0x361   :  { %2740 = vst [vmem:[#allocation15_spill] sm:$0xff] %v2238_v49  ;;  %v2256_v61 = vld [vmem:[#allocation2 + $0x60] sm:$0xff] }
 0x362   :  { %1331 = vtanh.f32 %v524_v48  ;;  %2741 = vst [vmem:[#allocation16_spill] sm:$0xff] %v2241_v54  ;;  %v2253_v48 = vld [vmem:[#allocation2 + $0x98] sm:$0xff] }
 0x363   :  { %2742 = vst [vmem:[#allocation17_spill] sm:$0xff] %v2244_v57 }
 0x364   :  { %2745 = vst [vmem:[#allocation20_spill] sm:$0xff] %v2253_v48 }
 0x365   :  { %2746 = vst [vmem:[#allocation21_spill] sm:$0xff] %v2256_v61 }
 0x366   :  { %2747 = vst [vmem:[#allocation22_spill] sm:$0xff] %v2259_v1 }
 0x367   :  { %2748 = vst [vmem:[#allocation23_spill] sm:$0xff] %v2262_v2 }
 0x368   :  { %v1332_v4 = vpop.eup %1331 }
 0x369   :  { %v527_v5 = vmul.f32 %v1332_v4, %v526_v3  ;;  %v2265_v3 = vld [vmem:[#allocation2 + $0x78] sm:$0xff]  ;;  %v2268_v4 = vld [vmem:[#allocation2 + $0x40] sm:$0xff] }
 0x36a   :  { %2749 = vst [vmem:[#allocation24_spill] sm:$0xff] %v2265_v3 }
 0x36b   :  { %v2101_v7 = vadd.f32 %v528_v6, %v527_v5  ;;  %2750 = vst [vmem:[#allocation25_spill] sm:$0xff] %v2268_v4  ;;  %v2271_v5 = vld [vmem:[#allocation2 + $0x48] sm:$0xff]  ;;  %v2274_v6 = vld [vmem:[#allocation2 + $0x50] sm:$0xff] }
 0x36c   :  { %2751 = vst [vmem:[#allocation26_spill] sm:$0xff] %v2271_v5 }
 0x36d   :  { %533 = vrot.lane.b32.xlu1 %v2101_v7, %s1535_s30  ;;  %530 = vst [vmem:[%s2539_s6 + $0x2] sm:$0x1] %v2101_v7 }
 0x36e   :  { %2752 = vst [vmem:[#allocation27_spill] sm:$0xff] %v2274_v6 }
 0x3df   :  { %v534_v10 = vpop.permute.xlu1 %533 }
 0x3e0   :  { %v535_v11 = vadd.f32 %v534_v10, %v532_v9  ;;  %v2280_v9 = vld [vmem:[#allocation2 + $0x20] sm:$0xff]  ;;  %v2283_v10 = vld [vmem:[#allocation2 + $0x28] sm:$0xff] }
 0x3e1   :  { %2754 = vst [vmem:[#allocation29_spill] sm:$0xff] %v2280_v9 }
 0x3e2   :  { %552 = vmatmul.f32.vlgmr.msrb.gmra.mxu0 %v535_v11  ;;  %572 = vmatmul.f32.vlgmr.msrb.gmra.mxu1 %v535_v11  ;;  %2755 = vst [vmem:[#allocation30_spill] sm:$0xff] %v2283_v10 }
 0x3e3   :  { %592 = vmatmul.f32.vlgmr.msrb.gmra.mxu2 %v535_v11  ;;  %612 = vmatmul.f32.vlgmr.msrb.gmra.mxu3 %v535_v11  ;;  %v2286_v11 = vld [vmem:[#allocation2 + $0x30] sm:$0xff] }
 0x3e4   :  { %806 = vmatpush.msrb.mxu0 %v2112_v56  ;;  %826 = vmatpush.msrb.mxu1 %v2115_v12  ;;  %2756 = vst [vmem:[#allocation31_spill] sm:$0xff] %v2286_v11 }
 0x3e5   :  { %846 = vmatpush.msrb.mxu2 %v2118_v13  ;;  %866 = vmatpush.msrb.mxu3 %v2121_v14 }
 0x3e6   :  { %807 = vmatpush.msrb.mxu0 %v2124_v15  ;;  %827 = vmatpush.msrb.mxu1 %v2127_v16 }
 0x3e7   :  { %847 = vmatpush.msrb.mxu2 %v2130_v17  ;;  %867 = vmatpush.msrb.mxu3 %v2133_v18 }
 0x3e8   :  { %808 = vmatpush.msrb.mxu0 %v2136_v19  ;;  %828 = vmatpush.msrb.mxu1 %v2139_v20 }
 0x3e9   :  { %848 = vmatpush.msrb.mxu2 %v2142_v21  ;;  %868 = vmatpush.msrb.mxu3 %v2145_v22 }
 0x3ea   :  { %809 = vmatpush.msrb.mxu0 %v2148_v23  ;;  %829 = vmatpush.msrb.mxu1 %v2151_v24 }
 0x3eb   :  { %849 = vmatpush.msrb.mxu2 %v2154_v25  ;;  %869 = vmatpush.msrb.mxu3 %v2157_v26 }
 0x3ec   :  { %810 = vmatpush.msrb.mxu0 %v2160_v27  ;;  %830 = vmatpush.msrb.mxu1 %v2163_v29 }
 0x3ed   :  { %850 = vmatpush.msrb.mxu2 %v2166_v31  ;;  %870 = vmatpush.msrb.mxu3 %v2169_v32 }
 0x3ee   :  { %811 = vmatpush.msrb.mxu0 %v2172_v33  ;;  %831 = vmatpush.msrb.mxu1 %v2175_v34 }
 0x3ef   :  { %851 = vmatpush.msrb.mxu2 %v2178_v35  ;;  %871 = vmatpush.msrb.mxu3 %v2181_v37 }
 0x3f0   :  { %812 = vmatpush.msrb.mxu0 %v2184_v38  ;;  %832 = vmatpush.msrb.mxu1 %v2187_v39 }
 0x3f1   :  { %852 = vmatpush.msrb.mxu2 %v2190_v36  ;;  %872 = vmatpush.msrb.mxu3 %v2193_v0 }
 0x3f2   :  { %813 = vmatpush.msrb.mxu0 %v2196_v58  ;;  %833 = vmatpush.msrb.mxu1 %v2199_v62 }
 0x3f3   :  { %853 = vmatpush.msrb.mxu2 %v2202_v46  ;;  %873 = vmatpush.msrb.mxu3 %v2205_v60 }
 0x3f4   :  { %814 = vmatpush.msrb.mxu0 %v2208_v44  ;;  %834 = vmatpush.msrb.mxu1 %v2211_v43 }
 0x3f5   :  { %854 = vmatpush.msrb.mxu2 %v2214_v45  ;;  %874 = vmatpush.msrb.mxu3 %v2217_v47 }
 0x3f6   :  { %815 = vmatpush.msrb.mxu0 %v2220_v51  ;;  %835 = vmatpush.msrb.mxu1 %v2223_v42 }
 0x3f7   :  { %855 = vmatpush.msrb.mxu2 %v2226_v52  ;;  %875 = vmatpush.msrb.mxu3 %v2229_v59 }
 0x3f8   :  { %816 = vmatpush.msrb.mxu0 %v2232_v50  ;;  %836 = vmatpush.msrb.mxu1 %v2235_v53 }
 0x3f9   :  { %856 = vmatpush.msrb.mxu2 %v2238_v49  ;;  %876 = vmatpush.msrb.mxu3 %v2241_v54 }
 0x3fa   :  { %817 = vmatpush.msrb.mxu0 %v2244_v57  ;;  %837 = vmatpush.msrb.mxu1 %v2247_v40 }
 0x3fb   :  { %857 = vmatpush.msrb.mxu2 %v2250_v41  ;;  %877 = vmatpush.msrb.mxu3 %v2253_v48 }
 0x3fc   :  { %818 = vmatpush.msrb.mxu0 %v2256_v61  ;;  %838 = vmatpush.msrb.mxu1 %v2259_v1 }
 0x3fd   :  { %858 = vmatpush.msrb.mxu2 %v2262_v2  ;;  %878 = vmatpush.msrb.mxu3 %v2265_v3 }
 0x3fe   :  { %819 = vmatpush.msrb.mxu0 %v2268_v4  ;;  %839 = vmatpush.msrb.mxu1 %v2271_v5  ;;  %v2289_v5 = vld [vmem:[#allocation2 + $0x38] sm:$0xff] }
 0x3ff   :  { %859 = vmatpush.msrb.mxu2 %v2274_v6  ;;  %879 = vmatpush.msrb.mxu3 %v2277_v8  ;;  %2757 = vst [vmem:[#allocation32_spill] sm:$0xff] %v2289_v5  ;;  %v2292_v6 = vld [vmem:[#allocation2] sm:$0xff]  ;;  %v2295_v8 = vld [vmem:[#allocation2 + $0x8] sm:$0xff] }
 0x400   :  { %820 = vmatpush.msrb.mxu0 %v2280_v9  ;;  %840 = vmatpush.msrb.mxu1 %v2283_v10  ;;  %2758 = vst [vmem:[#allocation33_spill] sm:$0xff] %v2292_v6  ;;  %v2298_v9 = vld [vmem:[#allocation2 + $0x10] sm:$0xff]  ;;  %v2301_v10 = vld [vmem:[#allocation2 + $0x18] sm:$0xff] }
 0x401   :  { %860 = vmatpush.msrb.mxu2 %v2286_v11  ;;  %880 = vmatpush.msrb.mxu3 %v2289_v5  ;;  %2759 = vst [vmem:[#allocation34_spill] sm:$0xff] %v2295_v8 }
 0x402   :  { %821 = vmatpush.msrb.mxu0 %v2292_v6  ;;  %841 = vmatpush.msrb.mxu1 %v2295_v8  ;;  %2760 = vst [vmem:[#allocation35_spill] sm:$0xff] %v2298_v9 }
 0x403   :  { %861 = vmatpush.msrb.mxu2 %v2298_v9  ;;  %2761 = vst [vmem:[#allocation36_spill] sm:$0xff] %v2301_v10  ;;  %881 = vmatpush.msrb.mxu3 %v2301_v10 }
 0x45f   :  { %v553_v11 = vpop.f32.mrf.mxu0  ;;  %v573_v4 = vpop.f32.mrf.mxu1 }
 0x460   :  { %v616_v5 = vadd.f32 %v553_v11, %v2735_v28  ;;  %v636_v3 = vadd.f32 %v573_v4, %v2736_v30 }
 0x462   :  { %v1284_v2 = vmul.f32 -1.442695, %v616_v5  ;;  %v1285_v6 = vmul.f32 -1.442695, %v636_v3 }
 0x464   :  { %1333 = vpow2.f32 %v1284_v2 }
 0x465   :  { %1335 = vpow2.f32 %v1285_v6 }
 0x466   :  { %v613_v4 = vpop.f32.mrf.mxu3  ;;  %v593_v5 = vpop.f32.mrf.mxu2 }
 0x46a   :  { %v1334_v1 = vpop.eup %1333 }
 0x46b   :  { %v1336_v8 = vpop.eup %1335  ;;  %v620_v61 = vadd.f32 1.0, %v1334_v1 }
 0x46c   :  { %v640_v48 = vadd.f32 1.0, %v1336_v8  ;;  %v657_v8 = vadd.f32 %v613_v4, %v1931_v55 }
 0x46d   :  { %1337 = vrcp.f32 %v620_v61  ;;  %v632_v49 = vand.u32 2147483648, %v620_v61  ;;  %v630_v30 = vand.u32 2147483647, %v620_v61  ;;  %vm626_vm9 = vweird.f32 %v620_v61 }
 0x46e   :  { %1339 = vrcp.f32 %v640_v48  ;;  %vm646_vm13 = vweird.f32 %v640_v48  ;;  %v650_v50 = vand.u32 2147483647, %v640_v48 }
 0x46f   :  { %v633_v1 = vor.u32 1.1754944e-38, %v632_v49  ;;  %vm631_vm11 = vcmp.eq.f32.partialorder %v630_v30, 8.507059e+37 }
 0x470   :  { %vm651_vm15 = vcmp.eq.f32.partialorder %v650_v50, 8.507059e+37 }
 0x473   :  { %v1338_v9 = vpop.eup %1337 }
 0x474   :  { %v1340_v41 = vpop.eup %1339  ;;  %v622_v40 = vmul.f32 %v1338_v9, %v620_v61  ;;  %vm627_vm8 = vweird.f32 %v1338_v9 }
 0x475   :  { %v642_v10 = vmul.f32 %v1340_v41, %v640_v48  ;;  %vm628_vm10 = vmor %vm626_vm9, %vm627_vm8  ;;  %vm647_vm12 = vweird.f32 %v1340_v41 }
 0x476   :  { %v623_v57 = vsub.f32 1.0, %v622_v40  ;;  %v656_v40 = vadd.f32 %v593_v5, %v1936_v63  ;;  %vm648_vm14 = vmor %vm646_vm13, %vm647_vm12  ;;  %v666_v63 = vld [vmem:[%s2533_s0 + $0x4] sm:$0x1]  ;;  %v2767_v5 = vld [vmem:[#allocation17_spill] sm:$0xff] }
 0x477   :  { %v643_v54 = vsub.f32 1.0, %v642_v10 }
 0x478   :  { %v624_v28 = vmul.f32 %v1338_v9, %v623_v57  ;;  %v652_v57 = vand.u32 2147483648, %v640_v48  ;;  %v2764_v48 = vld [vmem:[#allocation14_spill] sm:$0xff] }
 0x479   :  { %v644_v3 = vmul.f32 %v1340_v41, %v643_v54 }
 0x47a   :  { %v625_v2 = vadd.f32 %v1338_v9, %v624_v28  ;;  %v653_v61 = vor.u32 1.1754944e-38, %v652_v57  ;;  %v2774_v57 = vld [vmem:[#allocation24_spill] sm:$0xff] }
 0x47b   :  { %v645_v53 = vadd.f32 %v1340_v41, %v644_v3  ;;  %v2765_v3 = vld [vmem:[#allocation15_spill] sm:$0xff] }
 0x47c   :  { %v629_v6 = vsel %vm628_vm10, %v1338_v9, %v625_v2  ;;  %v2766_v2 = vld [vmem:[#allocation16_spill] sm:$0xff] }
 0x47d   :  { %v634_v11 = vsel %vm631_vm11, %v633_v1, %v629_v6  ;;  %v649_v54 = vsel %vm648_vm14, %v1340_v41, %v645_v53  ;;  %v2763_v41 = vld [vmem:[#allocation13_spill] sm:$0xff]  ;;  %v2768_v1 = vld [vmem:[#allocation18_spill] sm:$0xff]  ;;  %v2769_v6 = vld [vmem:[#allocation19_spill] sm:$0xff] }
 0x47e   :  { %v658_v10 = vmul.f32 %v657_v8, %v634_v11  ;;  %v654_v49 = vsel %vm651_vm15, %v653_v61, %v649_v54  ;;  %v2770_v8 = vld [vmem:[#allocation20_spill] sm:$0xff]  ;;  %v2771_v11 = vld [vmem:[#allocation21_spill] sm:$0xff]  ;;  %v2776_v61 = vld [vmem:[#allocation26_spill] sm:$0xff] }
 0x47f   :  { %v661_v9 = vsub.f32 1.0, %v654_v49  ;;  %v663_v55 = vmul.f32 %v654_v49, %v2101_v7  ;;  %v2762_v7 = vld [vmem:[#allocation11_spill] sm:$0xff]  ;;  %v2775_v54 = vld [vmem:[#allocation25_spill] sm:$0xff] }
 0x480   :  { %v659_v59 = vadd.f32 %v658_v10, %v656_v40  ;;  %v2772_v40 = vld [vmem:[#allocation22_spill] sm:$0xff]  ;;  %v2773_v10 = vld [vmem:[#allocation23_spill] sm:$0xff] }
 0x481   :  { %v2777_v49 = vld [vmem:[#allocation27_spill] sm:$0xff] }
 0x482   :  { %1341 = vtanh.f32 %v659_v59  ;;  %v667_v59 = vmax.f32 %v666_v63, 0.0  ;;  %v2782_v63 = vld [vmem:[#allocation32_spill] sm:$0xff] }
 0x488   :  { %v1342_v28 = vpop.eup %1341 }
 0x489   :  { %v662_v30 = vmul.f32 %v1342_v28, %v661_v9  ;;  %v2778_v9 = vld [vmem:[#allocation28_spill] sm:$0xff]  ;;  %v2779_v28 = vld [vmem:[#allocation29_spill] sm:$0xff] }
 0x48b   :  { %v2309_v4 = vadd.f32 %v663_v55, %v662_v30  ;;  %v2780_v30 = vld [vmem:[#allocation30_spill] sm:$0xff]  ;;  %v2781_v55 = vld [vmem:[#allocation31_spill] sm:$0xff] }
 0x48d   :  { %668 = vrot.lane.b32.xlu2 %v2309_v4, %s1535_s30  ;;  %665 = vst [vmem:[%s2539_s6 + $0x3] sm:$0x1] %v2309_v4 }
 0x4e7   :  { %v669_v50 = vpop.permute.xlu2 %668 }
 0x4e8   :  { %v670_v53 = vadd.f32 %v669_v50, %v667_v59  ;;  %v2783_v59 = vld [vmem:[#allocation33_spill] sm:$0xff]  ;;  %v2784_v50 = vld [vmem:[#allocation34_spill] sm:$0xff] }
 0x4ea   :  { %687 = vmatmul.f32.vlgmr.msra.gmra.mxu0 %v670_v53  ;;  %707 = vmatmul.f32.vlgmr.msra.gmra.mxu1 %v670_v53 }
 0x4eb   :  { %727 = vmatmul.f32.vlgmr.msra.gmra.mxu2 %v670_v53  ;;  %747 = vmatmul.f32.vlgmr.msra.gmra.mxu3 %v670_v53  ;;  %v2785_v53 = vld [vmem:[#allocation35_spill] sm:$0xff] }
 0x4ec   :  { %941 = vmatpush.msra.mxu0 %v2112_v56  ;;  %961 = vmatpush.msra.mxu1 %v2115_v12 }
 0x4ed   :  { %981 = vmatpush.msra.mxu2 %v2118_v13  ;;  %1001 = vmatpush.msra.mxu3 %v2121_v14 }
 0x4ee   :  { %942 = vmatpush.msra.mxu0 %v2124_v15  ;;  %962 = vmatpush.msra.mxu1 %v2127_v16 }
 0x4ef   :  { %982 = vmatpush.msra.mxu2 %v2130_v17  ;;  %1002 = vmatpush.msra.mxu3 %v2133_v18 }
 0x4f0   :  { %943 = vmatpush.msra.mxu0 %v2136_v19  ;;  %963 = vmatpush.msra.mxu1 %v2139_v20 }
 0x4f1   :  { %983 = vmatpush.msra.mxu2 %v2142_v21  ;;  %1003 = vmatpush.msra.mxu3 %v2145_v22 }
 0x4f2   :  { %944 = vmatpush.msra.mxu0 %v2148_v23  ;;  %964 = vmatpush.msra.mxu1 %v2151_v24 }
 0x4f3   :  { %984 = vmatpush.msra.mxu2 %v2154_v25  ;;  %1004 = vmatpush.msra.mxu3 %v2157_v26 }
 0x4f4   :  { %945 = vmatpush.msra.mxu0 %v2160_v27  ;;  %965 = vmatpush.msra.mxu1 %v2163_v29 }
 0x4f5   :  { %985 = vmatpush.msra.mxu2 %v2166_v31  ;;  %1005 = vmatpush.msra.mxu3 %v2169_v32 }
 0x4f6   :  { %946 = vmatpush.msra.mxu0 %v2172_v33  ;;  %966 = vmatpush.msra.mxu1 %v2175_v34 }
 0x4f7   :  { %986 = vmatpush.msra.mxu2 %v2178_v35  ;;  %1006 = vmatpush.msra.mxu3 %v2181_v37 }
 0x4f8   :  { %947 = vmatpush.msra.mxu0 %v2184_v38  ;;  %967 = vmatpush.msra.mxu1 %v2187_v39 }
 0x4f9   :  { %987 = vmatpush.msra.mxu2 %v2190_v36  ;;  %1007 = vmatpush.msra.mxu3 %v2193_v0 }
 0x4fa   :  { %948 = vmatpush.msra.mxu0 %v2196_v58  ;;  %968 = vmatpush.msra.mxu1 %v2199_v62 }
 0x4fb   :  { %988 = vmatpush.msra.mxu2 %v2202_v46  ;;  %1008 = vmatpush.msra.mxu3 %v2205_v60 }
 0x4fc   :  { %949 = vmatpush.msra.mxu0 %v2208_v44  ;;  %969 = vmatpush.msra.mxu1 %v2211_v43 }
 0x4fd   :  { %989 = vmatpush.msra.mxu2 %v2214_v45  ;;  %1009 = vmatpush.msra.mxu3 %v2217_v47 }
 0x4fe   :  { %950 = vmatpush.msra.mxu0 %v2220_v51  ;;  %970 = vmatpush.msra.mxu1 %v2223_v42 }
 0x4ff   :  { %990 = vmatpush.msra.mxu2 %v2226_v52  ;;  %1010 = vmatpush.msra.mxu3 %v2762_v7 }
 0x500   :  { %951 = vmatpush.msra.mxu0 %v2763_v41  ;;  %971 = vmatpush.msra.mxu1 %v2764_v48 }
 0x501   :  { %991 = vmatpush.msra.mxu2 %v2765_v3  ;;  %1011 = vmatpush.msra.mxu3 %v2766_v2 }
 0x502   :  { %952 = vmatpush.msra.mxu0 %v2767_v5  ;;  %972 = vmatpush.msra.mxu1 %v2768_v1 }
 0x503   :  { %992 = vmatpush.msra.mxu2 %v2769_v6  ;;  %1012 = vmatpush.msra.mxu3 %v2770_v8 }
 0x504   :  { %953 = vmatpush.msra.mxu0 %v2771_v11  ;;  %973 = vmatpush.msra.mxu1 %v2772_v40 }
 0x505   :  { %993 = vmatpush.msra.mxu2 %v2773_v10  ;;  %1013 = vmatpush.msra.mxu3 %v2774_v57 }
 0x506   :  { %954 = vmatpush.msra.mxu0 %v2775_v54  ;;  %974 = vmatpush.msra.mxu1 %v2776_v61  ;;  %v2786_v54 = vld [vmem:[#allocation36_spill] sm:$0xff] }
 0x507   :  { %994 = vmatpush.msra.mxu2 %v2777_v49  ;;  %1014 = vmatpush.msra.mxu3 %v2778_v9 }
 0x508   :  { %955 = vmatpush.msra.mxu0 %v2779_v28  ;;  %975 = vmatpush.msra.mxu1 %v2780_v30  ;;  %v2387_v28 = vld [vmem:[%s2536_s3] sm:$0x1] }
 0x509   :  { %995 = vmatpush.msra.mxu2 %v2781_v55  ;;  %1015 = vmatpush.msra.mxu3 %v2782_v63  ;;  %2787 = vst [vmem:[#allocation37_spill] sm:$0xff] %v2387_v28  ;;  %v2393_v63 = vld [vmem:[%s2536_s3 + $0x1] sm:$0x1] }
 0x50a   :  { %956 = vmatpush.msra.mxu0 %v2783_v59  ;;  %976 = vmatpush.msra.mxu1 %v2784_v50  ;;  %2788 = vst [vmem:[#allocation12_spill] sm:$0xff] %v2393_v63 }
 0x50b   :  { %996 = vmatpush.msra.mxu2 %v2785_v53  ;;  %1016 = vmatpush.msra.mxu3 %v2786_v54 }
 0x567   :  { %v688_v61 = vpop.f32.mrf.mxu0  ;;  %v708_v49 = vpop.f32.mrf.mxu1 }
 0x568   :  { %v751_v30 = vadd.f32 %v2387_v28, %v688_v61  ;;  %v771_v50 = vadd.f32 %v2393_v63, %v708_v49  ;;  %v2399_v63 = vld [vmem:[%s2536_s3 + $0x3] sm:$0x1] }
 0x569   :  { %2789 = vst [vmem:[#allocation38_spill] sm:$0xff] %v2399_v63 }
 0x56a   :  { %v1286_v59 = vmul.f32 -1.442695, %v751_v30  ;;  %v1287_v53 = vmul.f32 -1.442695, %v771_v50 }
 0x56c   :  { %1343 = vpow2.f32 %v1286_v59 }
 0x56d   :  { %1345 = vpow2.f32 %v1287_v53 }
 0x56e   :  { %v748_v30 = vpop.f32.mrf.mxu3  ;;  %v728_v53 = vpop.f32.mrf.mxu2 }
 0x572   :  { %v1344_v54 = vpop.eup %1343 }
 0x573   :  { %v1346_v55 = vpop.eup %1345  ;;  %v755_v9 = vadd.f32 1.0, %v1344_v54 }
 0x574   :  { %v775_v57 = vadd.f32 1.0, %v1346_v55 }
 0x575   :  { %1347 = vrcp.f32 %v755_v9  ;;  %v767_v6 = vand.u32 2147483648, %v755_v9  ;;  %v765_v49 = vand.u32 2147483647, %v755_v9  ;;  %vm761_vm1 = vweird.f32 %v755_v9 }
 0x576   :  { %1349 = vrcp.f32 %v775_v57  ;;  %vm781_vm5 = vweird.f32 %v775_v57 }
 0x577   :  { %v768_v54 = vor.u32 1.1754944e-38, %v767_v6  ;;  %vm766_vm3 = vcmp.eq.f32.partialorder %v765_v49, 8.507059e+37 }
 0x57b   :  { %v1348_v10 = vpop.eup %1347 }
 0x57c   :  { %v1350_v40 = vpop.eup %1349  ;;  %v757_v61 = vmul.f32 %v1348_v10, %v755_v9  ;;  %vm762_vm0 = vweird.f32 %v1348_v10  ;;  %v785_v9 = vand.u32 2147483647, %v775_v57 }
 0x57d   :  { %v777_v28 = vmul.f32 %v1350_v40, %v775_v57  ;;  %vm763_vm2 = vmor %vm761_vm1, %vm762_vm0  ;;  %vm782_vm4 = vweird.f32 %v1350_v40 }
 0x57e   :  { %v758_v11 = vsub.f32 1.0, %v757_v61  ;;  %vm783_vm6 = vmor %vm781_vm5, %vm782_vm4  ;;  %vm786_vm7 = vcmp.eq.f32.partialorder %v785_v9, 8.507059e+37 }
 0x57f   :  { %v778_v8 = vsub.f32 1.0, %v777_v28  ;;  %v792_v28 = vadd.f32 %v2399_v63, %v748_v30 }
 0x580   :  { %v759_v1 = vmul.f32 %v1348_v10, %v758_v11 }
 0x581   :  { %v779_v50 = vmul.f32 %v1350_v40, %v778_v8 }
 0x582   :  { %v760_v59 = vadd.f32 %v1348_v10, %v759_v1  ;;  %v2405_v1 = vld [vmem:[%s2536_s3 + $0x2] sm:$0x1] }
 0x583   :  { %v780_v11 = vadd.f32 %v1350_v40, %v779_v50  ;;  %v791_v8 = vadd.f32 %v2405_v1, %v728_v53 }
 0x584   :  { %v764_v55 = vsel %vm763_vm2, %v1348_v10, %v760_v59  ;;  %v787_v10 = vand.u32 2147483648, %v775_v57 }
 0x585   :  { %v769_v61 = vsel %vm766_vm3, %v768_v54, %v764_v55  ;;  %v784_v59 = vsel %vm783_vm6, %v1350_v40, %v780_v11  ;;  %v801_v40 = vld [vmem:[%s2533_s0 + $0x5] sm:$0x1] }
 0x586   :  { %v793_v6 = vmul.f32 %v792_v28, %v769_v61  ;;  %v788_v5 = vor.u32 1.1754944e-38, %v787_v10 }
 0x588   :  { %v794_v49 = vadd.f32 %v793_v6, %v791_v8  ;;  %v789_v30 = vsel %vm786_vm7, %v788_v5, %v784_v59  ;;  %v802_v5 = vmax.f32 %v801_v40, 0.0  ;;  %v2813_v8 = vld [vmem:[#allocation38_spill] sm:$0xff] }
 0x589   :  { %v796_v50 = vsub.f32 1.0, %v789_v30  ;;  %v798_v63 = vmul.f32 %v789_v30, %v2309_v4 }
 0x58a   :  { %1351 = vtanh.f32 %v794_v49 }
 0x590   :  { %v1352_v54 = vpop.eup %1351 }
 0x591   :  { %v797_v55 = vmul.f32 %v1352_v54, %v796_v50 }
 0x593   :  { %v2409_v2 = vadd.f32 %v798_v63, %v797_v55 }
 0x595   :  { %803 = vrot.lane.b32.xlu2 %v2409_v2, %s1535_s30  ;;  %800 = vst [vmem:[%s2539_s6 + $0x4] sm:$0x1] %v2409_v2 }
 0x5ef   :  { %v804_v57 = vpop.permute.xlu2 %803 }
 0x5f0   :  { %v805_v53 = vadd.f32 %v804_v57, %v802_v5 }
 0x5f2   :  { %822 = vmatmul.f32.vlgmr.msrb.gmra.mxu0 %v805_v53  ;;  %842 = vmatmul.f32.vlgmr.msrb.gmra.mxu1 %v805_v53 }
 0x5f3   :  { %862 = vmatmul.f32.vlgmr.msrb.gmra.mxu2 %v805_v53  ;;  %882 = vmatmul.f32.vlgmr.msrb.gmra.mxu3 %v805_v53 }
 0x5f4   :  { %1076 = vmatpush.msrb.mxu0 %v2112_v56  ;;  %1096 = vmatpush.msrb.mxu1 %v2115_v12  ;;  %v2790_v56 = vld [vmem:[#allocation16_spill] sm:$0xff]  ;;  %v2791_v12 = vld [vmem:[#allocation17_spill] sm:$0xff] }
 0x5f5   :  { %1116 = vmatpush.msrb.mxu2 %v2118_v13  ;;  %1136 = vmatpush.msrb.mxu3 %v2121_v14  ;;  %v2792_v13 = vld [vmem:[#allocation18_spill] sm:$0xff]  ;;  %v2793_v14 = vld [vmem:[#allocation19_spill] sm:$0xff] }
 0x5f6   :  { %1077 = vmatpush.msrb.mxu0 %v2124_v15  ;;  %1097 = vmatpush.msrb.mxu1 %v2127_v16  ;;  %v2794_v15 = vld [vmem:[#allocation20_spill] sm:$0xff]  ;;  %v2795_v16 = vld [vmem:[#allocation21_spill] sm:$0xff] }
 0x5f7   :  { %1117 = vmatpush.msrb.mxu2 %v2130_v17  ;;  %1137 = vmatpush.msrb.mxu3 %v2133_v18  ;;  %v2796_v17 = vld [vmem:[#allocation22_spill] sm:$0xff]  ;;  %v2797_v18 = vld [vmem:[#allocation23_spill] sm:$0xff] }
 0x5f8   :  { %1078 = vmatpush.msrb.mxu0 %v2136_v19  ;;  %1098 = vmatpush.msrb.mxu1 %v2139_v20  ;;  %v2798_v19 = vld [vmem:[#allocation24_spill] sm:$0xff]  ;;  %v2799_v20 = vld [vmem:[#allocation25_spill] sm:$0xff] }
 0x5f9   :  { %1118 = vmatpush.msrb.mxu2 %v2142_v21  ;;  %1138 = vmatpush.msrb.mxu3 %v2145_v22  ;;  %v2800_v21 = vld [vmem:[#allocation26_spill] sm:$0xff]  ;;  %v2801_v22 = vld [vmem:[#allocation27_spill] sm:$0xff] }
 0x5fa   :  { %1079 = vmatpush.msrb.mxu0 %v2148_v23  ;;  %1099 = vmatpush.msrb.mxu1 %v2151_v24  ;;  %v2802_v23 = vld [vmem:[#allocation28_spill] sm:$0xff]  ;;  %v2803_v24 = vld [vmem:[#allocation29_spill] sm:$0xff] }
 0x5fb   :  { %1119 = vmatpush.msrb.mxu2 %v2154_v25  ;;  %1139 = vmatpush.msrb.mxu3 %v2157_v26  ;;  %v2804_v25 = vld [vmem:[#allocation30_spill] sm:$0xff]  ;;  %v2805_v26 = vld [vmem:[#allocation31_spill] sm:$0xff] }
 0x5fc   :  { %1080 = vmatpush.msrb.mxu0 %v2160_v27  ;;  %1100 = vmatpush.msrb.mxu1 %v2163_v29  ;;  %v2806_v27 = vld [vmem:[#allocation32_spill] sm:$0xff]  ;;  %v2807_v29 = vld [vmem:[#allocation33_spill] sm:$0xff] }
 0x5fd   :  { %1120 = vmatpush.msrb.mxu2 %v2166_v31  ;;  %1140 = vmatpush.msrb.mxu3 %v2169_v32  ;;  %v2808_v31 = vld [vmem:[#allocation34_spill] sm:$0xff]  ;;  %v2809_v32 = vld [vmem:[#allocation35_spill] sm:$0xff] }
 0x5fe   :  { %1081 = vmatpush.msrb.mxu0 %v2172_v33  ;;  %1101 = vmatpush.msrb.mxu1 %v2175_v34  ;;  %v2810_v33 = vld [vmem:[#allocation36_spill] sm:$0xff] }
 0x5ff   :  { %1121 = vmatpush.msrb.mxu2 %v2178_v35  ;;  %1141 = vmatpush.msrb.mxu3 %v2181_v37  ;;  %v2811_v37 = vld [vmem:[#allocation37_spill] sm:$0xff] }
 0x600   :  { %1082 = vmatpush.msrb.mxu0 %v2184_v38  ;;  %1102 = vmatpush.msrb.mxu1 %v2187_v39  ;;  %v2812_v39 = vld [vmem:[#allocation12_spill] sm:$0xff] }
 0x601   :  { %1122 = vmatpush.msrb.mxu2 %v2190_v36  ;;  %1142 = vmatpush.msrb.mxu3 %v2193_v0 }
 0x602   :  { %1083 = vmatpush.msrb.mxu0 %v2196_v58  ;;  %1103 = vmatpush.msrb.mxu1 %v2199_v62 }
 0x603   :  { %1123 = vmatpush.msrb.mxu2 %v2202_v46  ;;  %1143 = vmatpush.msrb.mxu3 %v2205_v60 }
 0x604   :  { %1084 = vmatpush.msrb.mxu0 %v2208_v44  ;;  %1104 = vmatpush.msrb.mxu1 %v2211_v43 }
 0x605   :  { %1124 = vmatpush.msrb.mxu2 %v2214_v45  ;;  %1144 = vmatpush.msrb.mxu3 %v2217_v47 }
 0x606   :  { %1085 = vmatpush.msrb.mxu0 %v2220_v51  ;;  %1105 = vmatpush.msrb.mxu1 %v2223_v42 }
 0x607   :  { %1125 = vmatpush.msrb.mxu2 %v2226_v52  ;;  %1145 = vmatpush.msrb.mxu3 %v2762_v7 }
 0x608   :  { %1086 = vmatpush.msrb.mxu0 %v2763_v41  ;;  %1106 = vmatpush.msrb.mxu1 %v2764_v48 }
 0x609   :  { %1126 = vmatpush.msrb.mxu2 %v2765_v3  ;;  %1146 = vmatpush.msrb.mxu3 %v2790_v56 }
 0x60a   :  { %1087 = vmatpush.msrb.mxu0 %v2791_v12  ;;  %1107 = vmatpush.msrb.mxu1 %v2792_v13 }
 0x60b   :  { %1127 = vmatpush.msrb.mxu2 %v2793_v14  ;;  %1147 = vmatpush.msrb.mxu3 %v2794_v15  ;;  %v936_v14 = vld [vmem:[%s2533_s0 + $0x6] sm:$0x1] }
 0x60c   :  { %1088 = vmatpush.msrb.mxu0 %v2795_v16  ;;  %1108 = vmatpush.msrb.mxu1 %v2796_v17  ;;  %v937_v15 = vmax.f32 %v936_v14, 0.0 }
 0x60d   :  { %1128 = vmatpush.msrb.mxu2 %v2797_v18  ;;  %1148 = vmatpush.msrb.mxu3 %v2798_v19 }
 0x60e   :  { %1089 = vmatpush.msrb.mxu0 %v2799_v20  ;;  %1109 = vmatpush.msrb.mxu1 %v2800_v21 }
 0x60f   :  { %1129 = vmatpush.msrb.mxu2 %v2801_v22  ;;  %1149 = vmatpush.msrb.mxu3 %v2802_v23 }
 0x610   :  { %1090 = vmatpush.msrb.mxu0 %v2803_v24  ;;  %1110 = vmatpush.msrb.mxu1 %v2804_v25 }
 0x611   :  { %1130 = vmatpush.msrb.mxu2 %v2805_v26  ;;  %1150 = vmatpush.msrb.mxu3 %v2806_v27 }
 0x612   :  { %1091 = vmatpush.msrb.mxu0 %v2807_v29  ;;  %1111 = vmatpush.msrb.mxu1 %v2808_v31 }
 0x613   :  { %1131 = vmatpush.msrb.mxu2 %v2809_v32  ;;  %1151 = vmatpush.msrb.mxu3 %v2810_v33 }
 0x66f   :  { %v823_v34 = vpop.f32.mrf.mxu0  ;;  %v843_v35 = vpop.f32.mrf.mxu1 }
 0x670   :  { %v886_v38 = vadd.f32 %v2811_v37, %v823_v34  ;;  %v906_v36 = vadd.f32 %v2812_v39, %v843_v35 }
 0x672   :  { %v1288_v0 = vmul.f32 -1.442695, %v886_v38  ;;  %v1289_v58 = vmul.f32 -1.442695, %v906_v36 }
 0x674   :  { %1353 = vpow2.f32 %v1288_v0 }
 0x675   :  { %1355 = vpow2.f32 %v1289_v58 }
 0x676   :  { %v883_v48 = vpop.f32.mrf.mxu3  ;;  %v863_v28 = vpop.f32.mrf.mxu2 }
 0x677   :  { %v927_v6 = vadd.f32 %v2813_v8, %v883_v48  ;;  %v926_v49 = vadd.f32 %v2405_v1, %v863_v28 }
 0x67a   :  { %v1354_v62 = vpop.eup %1353 }
 0x67b   :  { %v1356_v46 = vpop.eup %1355  ;;  %v890_v60 = vadd.f32 1.0, %v1354_v62 }
 0x67c   :  { %v910_v44 = vadd.f32 1.0, %v1356_v46 }
 0x67d   :  { %1357 = vrcp.f32 %v890_v60  ;;  %v902_v4 = vand.u32 2147483648, %v890_v60  ;;  %v900_v41 = vand.u32 2147483647, %v890_v60  ;;  %vm896_vm9 = vweird.f32 %v890_v60 }
 0x67e   :  { %1359 = vrcp.f32 %v910_v44  ;;  %v922_v30 = vand.u32 2147483648, %v910_v44  ;;  %vm916_vm13 = vweird.f32 %v910_v44  ;;  %v920_v50 = vand.u32 2147483647, %v910_v44 }
 0x67f   :  { %v903_v61 = vor.u32 1.1754944e-38, %v902_v4  ;;  %vm901_vm11 = vcmp.eq.f32.partialorder %v900_v41, 8.507059e+37 }
 0x680   :  { %v923_v40 = vor.u32 1.1754944e-38, %v922_v30  ;;  %vm921_vm15 = vcmp.eq.f32.partialorder %v920_v50, 8.507059e+37  ;;  %v1222_v30 = vld [vmem:[#allocation5 + $0x78] sm:$0xff]  ;;  %v1221_v50 = vld [vmem:[#allocation5 + $0x70] sm:$0xff] }
 0x683   :  { %v1358_v43 = vpop.eup %1357 }
 0x684   :  { %v1360_v45 = vpop.eup %1359  ;;  %v892_v47 = vmul.f32 %v1358_v43, %v890_v60  ;;  %vm897_vm8 = vweird.f32 %v1358_v43 }
 0x685   :  { %v912_v51 = vmul.f32 %v1360_v45, %v910_v44  ;;  %vm898_vm10 = vmor %vm896_vm9, %vm897_vm8  ;;  %vm917_vm12 = vweird.f32 %v1360_v45 }
 0x686   :  { %v893_v42 = vsub.f32 1.0, %v892_v47  ;;  %vm918_vm14 = vmor %vm916_vm13, %vm917_vm12 }
 0x687   :  { %v913_v52 = vsub.f32 1.0, %v912_v51 }
 0x688   :  { %v894_v7 = vmul.f32 %v1358_v43, %v893_v42 }
 0x689   :  { %v914_v3 = vmul.f32 %v1360_v45, %v913_v52 }
 0x68a   :  { %v895_v63 = vadd.f32 %v1358_v43, %v894_v7 }
 0x68b   :  { %v915_v9 = vadd.f32 %v1360_v45, %v914_v3 }
 0x68c   :  { %v899_v11 = vsel %vm898_vm10, %v1358_v43, %v895_v63 }
 0x68d   :  { %v904_v10 = vsel %vm901_vm11, %v903_v61, %v899_v11  ;;  %v919_v55 = vsel %vm918_vm14, %v1360_v45, %v915_v9 }
 0x68e   :  { %v928_v59 = vmul.f32 %v927_v6, %v904_v10  ;;  %v924_v5 = vsel %vm921_vm15, %v923_v40, %v919_v55  ;;  %v1071_v10 = vld [vmem:[%s2533_s0 + $0x7] sm:$0x1]  ;;  %v1218_v40 = vld [vmem:[#allocation5 + $0x58] sm:$0xff] }
 0x68f   :  { %v931_v57 = vsub.f32 1.0, %v924_v5  ;;  %v933_v12 = vmul.f32 %v924_v5, %v2409_v2  ;;  %v1072_v9 = vmax.f32 %v1071_v10, 0.0  ;;  %v1219_v55 = vld [vmem:[#allocation5 + $0x60] sm:$0xff] }
 0x690   :  { %v929_v54 = vadd.f32 %v928_v59, %v926_v49 }
 0x692   :  { %1361 = vtanh.f32 %v929_v54  ;;  %v1220_v54 = vld [vmem:[#allocation5 + $0x68] sm:$0xff] }
 0x698   :  { %v1362_v53 = vpop.eup %1361 }
 0x699   :  { %v932_v56 = vmul.f32 %v1362_v53, %v931_v57 }
 0x69b   :  { %v2489_v13 = vadd.f32 %v933_v12, %v932_v56  ;;  %v1217_v12 = vld [vmem:[#allocation5 + $0x50] sm:$0xff] }
 0x69d   :  { %938 = vrot.lane.b32.xlu0 %v2489_v13, %s1535_s30  ;;  %935 = vst [vmem:[%s2539_s6 + $0x5] sm:$0x1] %v2489_v13 }
 0x70f   :  { %v939_v16 = vpop.permute.xlu0 %938 }
 0x710   :  { %v940_v17 = vadd.f32 %v939_v16, %v937_v15  ;;  %v1216_v15 = vld [vmem:[#allocation5 + $0x48] sm:$0xff]  ;;  %v1215_v16 = vld [vmem:[#allocation5 + $0x40] sm:$0xff] }
 0x712   :  { %957 = vmatmul.f32.vlgmr.msra.gmra.mxu0 %v940_v17  ;;  %977 = vmatmul.f32.vlgmr.msra.gmra.mxu1 %v940_v17 }
 0x713   :  { %997 = vmatmul.f32.vlgmr.msra.gmra.mxu2 %v940_v17  ;;  %1017 = vmatmul.f32.vlgmr.msra.gmra.mxu3 %v940_v17  ;;  %v1214_v17 = vld [vmem:[#allocation5 + $0x38] sm:$0xff] }
 0x714   :  { %1224 = vmatpush.msra.mxu0 %v1222_v30 }
 0x716   :  { %1225 = vmatpush.msra.mxu0 %v1221_v50 }
 0x718   :  { %1226 = vmatpush.msra.mxu0 %v1220_v54 }
 0x71a   :  { %1227 = vmatpush.msra.mxu0 %v1219_v55 }
 0x71c   :  { %1228 = vmatpush.msra.mxu0 %v1218_v40 }
 0x71e   :  { %1229 = vmatpush.msra.mxu0 %v1217_v12 }
 0x720   :  { %1230 = vmatpush.msra.mxu0 %v1216_v15 }
 0x722   :  { %1231 = vmatpush.msra.mxu0 %v1215_v16 }
 0x724   :  { %1232 = vmatpush.msra.mxu0 %v1214_v17 }
 0x78f   :  { %v958_v2 = vpop.f32.mrf.mxu0  ;;  %v978_v18 = vpop.f32.mrf.mxu1 }
 0x790   :  { %v1021_v19 = vadd.f32 %v2811_v37, %v958_v2  ;;  %v1041_v20 = vadd.f32 %v2812_v39, %v978_v18  ;;  %v1213_v2 = vld [vmem:[#allocation5 + $0x30] sm:$0xff] }
 0x791   :  { %1233 = vmatpush.msra.mxu0 %v1213_v2 }
 0x792   :  { %v1290_v21 = vmul.f32 -1.442695, %v1021_v19  ;;  %v1291_v22 = vmul.f32 -1.442695, %v1041_v20  ;;  %v1212_v19 = vld [vmem:[#allocation5 + $0x28] sm:$0xff] }
 0x793   :  { %1234 = vmatpush.msra.mxu0 %v1212_v19 }
 0x794   :  { %1363 = vpow2.f32 %v1290_v21  ;;  %v1211_v21 = vld [vmem:[#allocation5 + $0x20] sm:$0xff] }
 0x795   :  { %1365 = vpow2.f32 %v1291_v22  ;;  %1235 = vmatpush.msra.mxu0 %v1211_v21  ;;  %v1210_v22 = vld [vmem:[#allocation5 + $0x18] sm:$0xff] }
 0x796   :  { %v1018_v0 = vpop.f32.mrf.mxu3  ;;  %v998_v46 = vpop.f32.mrf.mxu2 }
 0x797   :  { %v1062_v43 = vadd.f32 %v2813_v8, %v1018_v0  ;;  %v1061_v51 = vadd.f32 %v2405_v1, %v998_v46  ;;  %1236 = vmatpush.msra.mxu0 %v1210_v22 }
 0x79a   :  { %v1364_v23 = vpop.eup %1363 }
 0x79b   :  { %v1366_v24 = vpop.eup %1365  ;;  %v1025_v25 = vadd.f32 1.0, %v1364_v23  ;;  %v1209_v23 = vld [vmem:[#allocation5 + $0x10] sm:$0xff] }
 0x79c   :  { %v1045_v26 = vadd.f32 1.0, %v1366_v24  ;;  %v1208_v24 = vld [vmem:[#allocation5 + $0x8] sm:$0xff]  ;;  %1237 = vmatpush.msra.mxu0 %v1209_v23 }
 0x79d   :  { %1367 = vrcp.f32 %v1025_v25  ;;  %v1037_v35 = vand.u32 2147483648, %v1025_v25  ;;  %v1035_v36 = vand.u32 2147483647, %v1025_v25  ;;  %vm1031_vm1 = vweird.f32 %v1025_v25 }
 0x79e   :  { %1369 = vrcp.f32 %v1045_v26  ;;  %v1057_v52 = vand.u32 2147483648, %v1045_v26  ;;  %vm1051_vm5 = vweird.f32 %v1045_v26  ;;  %v1055_v4 = vand.u32 2147483647, %v1045_v26  ;;  %1238 = vmatpush.msra.mxu0 %v1208_v24 }
 0x79f   :  { %v1038_v60 = vor.u32 1.1754944e-38, %v1037_v35  ;;  %vm1036_vm3 = vcmp.eq.f32.partialorder %v1035_v36, 8.507059e+37 }
 0x7a0   :  { %v1058_v48 = vor.u32 1.1754944e-38, %v1057_v52  ;;  %vm1056_vm7 = vcmp.eq.f32.partialorder %v1055_v4, 8.507059e+37 }
 0x7a3   :  { %v1368_v27 = vpop.eup %1367 }
 0x7a4   :  { %v1370_v29 = vpop.eup %1369  ;;  %v1027_v31 = vmul.f32 %v1368_v27, %v1025_v25  ;;  %vm1032_vm0 = vweird.f32 %v1368_v27  ;;  %v1207_v25 = vld [vmem:[#allocation5] sm:$0xff] }
 0x7a5   :  { %v1047_v32 = vmul.f32 %v1370_v29, %v1045_v26  ;;  %vm1033_vm2 = vmor %vm1031_vm1, %vm1032_vm0  ;;  %vm1052_vm4 = vweird.f32 %v1370_v29  ;;  %1239 = vmatpush.msra.mxu0 %v1207_v25 }
 0x7a6   :  { %v1028_v33 = vsub.f32 1.0, %v1027_v31  ;;  %vm1053_vm6 = vmor %vm1051_vm5, %vm1052_vm4 }
 0x7a7   :  { %v1048_v34 = vsub.f32 1.0, %v1047_v32 }
 0x7a8   :  { %v1029_v38 = vmul.f32 %v1368_v27, %v1028_v33 }
 0x7a9   :  { %v1049_v58 = vmul.f32 %v1370_v29, %v1048_v34 }
 0x7aa   :  { %v1030_v62 = vadd.f32 %v1368_v27, %v1029_v38 }
 0x7ab   :  { %v1050_v47 = vadd.f32 %v1370_v29, %v1049_v58 }
 0x7ac   :  { %v1034_v44 = vsel %vm1033_vm2, %v1368_v27, %v1030_v62 }
 0x7ad   :  { %v1039_v45 = vsel %vm1036_vm3, %v1038_v60, %v1034_v44  ;;  %v1054_v41 = vsel %vm1053_vm6, %v1370_v29, %v1050_v47 }
 0x7ae   :  { %v1063_v42 = vmul.f32 %v1062_v43, %v1039_v45  ;;  %v1059_v3 = vsel %vm1056_vm7, %v1058_v48, %v1054_v41 }
 0x7af   :  { %v1066_v63 = vsub.f32 1.0, %v1059_v3  ;;  %v1068_v11 = vmul.f32 %v1059_v3, %v2489_v13 }
 0x7b0   :  { %v1064_v7 = vadd.f32 %v1063_v42, %v1061_v51 }
 0x7b2   :  { %1371 = vtanh.f32 %v1064_v7 }
 0x7b8   :  { %v1372_v28 = vpop.eup %1371 }
 0x7b9   :  { %v1067_v61 = vmul.f32 %v1372_v28, %v1066_v63 }
 0x7bb   :  { %v2505_v6 = vadd.f32 %v1068_v11, %v1067_v61  ;;  %v1302_v11 = vld [vmem:[%s2536_s3 + $0x4] ss:$0 sm:$0xff] }
 0x7bd   :  { %1073 = vrot.lane.b32.xlu1 %v2505_v6, %s1535_s30  ;;  %1070 = vst [vmem:[%s2539_s6 + $0x6] sm:$0x1] %v2505_v6 }
 0x82f   :  { %v1074_v49 = vpop.permute.xlu1 %1073 }
 0x830   :  { %v1075_v59 = vadd.f32 %v1074_v49, %v1072_v9 }
 0x832   :  { %1092 = vmatmul.f32.vlgmr.msrb.gmra.mxu0 %v1075_v59  ;;  %1112 = vmatmul.f32.vlgmr.msrb.gmra.mxu1 %v1075_v59 }
 0x833   :  { %1132 = vmatmul.f32.vlgmr.msrb.gmra.mxu2 %v1075_v59  ;;  %1152 = vmatmul.f32.vlgmr.msrb.gmra.mxu3 %v1075_v59 }
 0x8af   :  { %v1093_v5 = vpop.f32.mrf.mxu0  ;;  %v1113_v57 = vpop.f32.mrf.mxu1 }
 0x8b0   :  { %v1156_v53 = vadd.f32 %v2811_v37, %v1093_v5  ;;  %v1176_v56 = vadd.f32 %v2812_v39, %v1113_v57 }
 0x8b2   :  { %v1292_v13 = vmul.f32 -1.442695, %v1156_v53  ;;  %v1293_v14 = vmul.f32 -1.442695, %v1176_v56 }
 0x8b4   :  { %1373 = vpow2.f32 %v1292_v13 }
 0x8b5   :  { %1375 = vpow2.f32 %v1293_v14 }
 0x8b6   :  { %v1153_v0 = vpop.f32.mrf.mxu3  ;;  %v1133_v62 = vpop.f32.mrf.mxu2 }
 0x8b7   :  { %v1197_v44 = vadd.f32 %v2813_v8, %v1153_v0  ;;  %v1196_v51 = vadd.f32 %v2405_v1, %v1133_v62 }
 0x8ba   :  { %v1374_v18 = vpop.eup %1373 }
 0x8bb   :  { %v1376_v20 = vpop.eup %1375  ;;  %v1160_v37 = vadd.f32 1.0, %v1374_v18 }
 0x8bc   :  { %v1180_v39 = vadd.f32 1.0, %v1376_v20 }
 0x8bd   :  { %1377 = vrcp.f32 %v1160_v37  ;;  %v1172_v34 = vand.u32 2147483648, %v1160_v37  ;;  %v1170_v38 = vand.u32 2147483647, %v1160_v37  ;;  %vm1166_vm9 = vweird.f32 %v1160_v37 }
 0x8be   :  { %1379 = vrcp.f32 %v1180_v39  ;;  %v1192_v47 = vand.u32 2147483648, %v1180_v39  ;;  %vm1186_vm13 = vweird.f32 %v1180_v39  ;;  %v1190_v52 = vand.u32 2147483647, %v1180_v39 }
 0x8bf   :  { %v1173_v46 = vor.u32 1.1754944e-38, %v1172_v34  ;;  %vm1171_vm11 = vcmp.eq.f32.partialorder %v1170_v38, 8.507059e+37 }
 0x8c0   :  { %v1193_v41 = vor.u32 1.1754944e-38, %v1192_v47  ;;  %vm1191_vm15 = vcmp.eq.f32.partialorder %v1190_v52, 8.507059e+37 }
 0x8c3   :  { %v1378_v26 = vpop.eup %1377 }
 0x8c4   :  { %v1380_v27 = vpop.eup %1379  ;;  %v1162_v29 = vmul.f32 %v1378_v26, %v1160_v37  ;;  %vm1167_vm8 = vweird.f32 %v1378_v26 }
 0x8c5   :  { %v1182_v31 = vmul.f32 %v1380_v27, %v1180_v39  ;;  %vm1168_vm10 = vmor %vm1166_vm9, %vm1167_vm8  ;;  %vm1187_vm12 = vweird.f32 %v1380_v27 }
 0x8c6   :  { %v1163_v32 = vsub.f32 1.0, %v1162_v29  ;;  %vm1188_vm14 = vmor %vm1186_vm13, %vm1187_vm12 }
 0x8c7   :  { %v1183_v33 = vsub.f32 1.0, %v1182_v31 }
 0x8c8   :  { %v1164_v35 = vmul.f32 %v1378_v26, %v1163_v32 }
 0x8c9   :  { %v1184_v36 = vmul.f32 %v1380_v27, %v1183_v33 }
 0x8ca   :  { %v1165_v58 = vadd.f32 %v1378_v26, %v1164_v35 }
 0x8cb   :  { %v1185_v43 = vadd.f32 %v1380_v27, %v1184_v36 }
 0x8cc   :  { %v1169_v60 = vsel %vm1168_vm10, %v1378_v26, %v1165_v58 }
 0x8cd   :  { %v1174_v45 = vsel %vm1171_vm11, %v1173_v46, %v1169_v60  ;;  %v1189_v7 = vsel %vm1188_vm14, %v1380_v27, %v1185_v43 }
 0x8ce   :  { %v1198_v42 = vmul.f32 %v1197_v44, %v1174_v45  ;;  %v1194_v48 = vsel %vm1191_vm15, %v1193_v41, %v1189_v7 }
 0x8cf   :  { %v1201_v3 = vsub.f32 1.0, %v1194_v48  ;;  %v1203_v8 = vmul.f32 %v1194_v48, %v2505_v6 }
 0x8d0   :  { %v1199_v4 = vadd.f32 %v1198_v42, %v1196_v51 }
 0x8d2   :  { %1381 = vtanh.f32 %v1199_v4 }
 0x8d8   :  { %v1382_v63 = vpop.eup %1381 }
 0x8d9   :  { %v1202_v28 = vmul.f32 %v1382_v63, %v1201_v3 }
 0x8db   :  { %v1204_v61 = vadd.f32 %v1203_v8, %v1202_v28 }
 0x8dd   :  { %1205 = vst [vmem:[%s2539_s6 + $0x7] sm:$0x1] %v1204_v61 }
 0x8e4   :  { %v1206_v1 = vld [vmem:[%s2539_s6] sm:$0xff]  ;;  %s1261_s6 = sshll.u32 %s1540_s2, 4  ;;  %s1262_s6 = int_to_ptr.vmem [resolvable:$true] %s1261_s6 }
 0x8e5   :  { %1240 = vmatmul.f32.vlgmr.msra.gmra.mxu0 %v1206_v1 }
 0x962   :  { %v1241_v10 = vpop.f32.mrf.mxu0 }
 0x963   :  { %v1242_v9 = vadd.f32 %v1302_v11, %v1241_v10 }
 0x965   :  { %1244 = vmax.xlane.f32.xlu2 %v1242_v9 }
 0x9d8   :  { %v1245_v49 = vpop.xlane.xlu2 %1244 }
 0x9d9   :  { %v1246_v59 = vsub.f32 %v1242_v9, %v1245_v49 }
 0x9db   :  { %v1247_v6 = vmul.f32 1.442695, %v1246_v59 }
 0x9dd   :  { %1383 = vpow2.f32 %v1247_v6 }
 0x9e3   :  { %v1384_v30 = vpop.eup %1383 }
 0x9e4   :  { %1249 = vadd.xlane.f32.xlu0 %v1384_v30 }
 0xa57   :  { %v1250_v50 = vpop.xlane.xlu0 %1249 }
 0xa58   :  { %1385 = vlog2.f32 %v1250_v50 }
 0xa5e   :  { %v1386_v54 = vpop.eup %1385 }
 0xa5f   :  { %v1252_v55 = vmul.f32 0.6931472, %v1386_v54 }
 0xa61   :  { %v1253_v40 = vadd.f32 %v1252_v55, %v1245_v49 }
 0xa63   :  { %v1254_v5 = vsub.f32 %v1242_v9, %v1253_v40 }
 0xa65   :  { %1255 = vst [vmem:[#allocation7] sm:$0xff] %v1254_v5 }
 0xa66   :  { %1266 = dma.vmem_to_hbm [thread:$0]  %s1262_s6, 128, %s1264_s13, [#allocation4]  }
 0xa67   :  { %1531 = dma.done.wait [#allocation4], 128  }
 0xa68   :  { %1532 = vsyncadd [#allocation4], 4294967168 }
 0xa69   :  { %1275 = vsyncpa [#allocation3], 1 }
 0xa6a   :  { %1276 = vsyncpa [#allocation6], 1 }
 0xa6b   :  { %1277 = vsyncpa [#allocation4], 1 }

</bundles_post_ra>
